<compile_context>
chip_gen: v5e
topology: v5e:2x2
jax: 0.10.0
libtpu: 0.0.40
codegen_flags: <defaults>
</compile_context>

<pallas_src>
import numpy as np
import jax
import jax.numpy as jnp
from jax import lax
from jax.experimental import pallas as pl
from jax.experimental.pallas import tpu as pltpu

HISTORY = 32      # history_signal
NUM_INPUTS = 4    # num_inputs
BATCH = 2
BN_EPS = 1e-5

CIN_PAD = 128               # all activations are padded to 128 lanes
K_IM2COL = 3 * CIN_PAD      # contraction size of every im2col conv matmul

CONV_SPECS = [
    # (Cin, Cout, dilation, followed_by_avgpool)
    (NUM_INPUTS, 32, 2, False),   # b0_tcn0
    (32, 64, 2, True),            # b0_tcn1 + b0_conv_pool
    (64, 64, 2, False),           # b1_tcn0
    (64, 128, 2, True),           # b1_tcn1 + b1_conv_pool
    (128, 128, 4, False),         # b2_tcn0
    (128, 128, 4, True),          # b2_tcn1 + b2_conv_pool
]

# misc (f32, 256 lanes) row layout:
#   row 0: FC0 bias/BN shift (256)     row 1: FC1 bias/BN shift (lanes 0:64)
#   row 2: GwayFC weight (lanes 0:64)  row 3, lane 0: GwayFC bias
#   rows 8..: per-layer, per-(batch,time,channel) conv shifts (lanes 0:128)
MISC_FC_ROWS = 8


def _layer_plan(batch):
    """Static per-layer metadata (sequence lengths, packed-array row offsets)."""
    plan, L, s_off = [], HISTORY, MISC_FC_ROWS
    for li, (cin, cout, d, pooled) in enumerate(CONV_SPECS):
        L_out = (L - 1) // 2 + 1 if pooled else L
        rows = batch * L_out
        plan.append(dict(cin=cin, cout=cout, d=d, pooled=pooled,
                         L_in=L, L_out=L_out,
                         w_off=li * K_IM2COL, s_off=s_off, s_rows=rows))
        s_off += rows + ((-rows) % 8)        # keep row offsets 8-aligned
        L = L_out
    return plan, len(CONV_SPECS) * K_IM2COL, s_off


LAYER_PLAN, WPACK_ROWS, _MISC_RAW = _layer_plan(BATCH)
MISC_ROWS = _MISC_RAW + ((-_MISC_RAW) % 8)
L3 = LAYER_PLAN[-1]["L_out"]                 # final time length (4)
DIM_FC = CIN_PAD * L3                        # 512, matches torch's dim_fc


# ----------------------------------------------------------------------------
# Pallas kernel (entire forward pass, single call)
# ----------------------------------------------------------------------------
def _avg_pool_flat(acc, batch, L):
    """AvgPool1d(3, stride=2, padding=1, count_include_pad=True) along time.

    acc: flat (B*L, C) f32.  One block-diagonal (B*T, B*L) pool matrix built
    from iotas (no integer div/rem) and applied with a single MXU matmul.
    Requires even L (true here: 32, 16, 8), so T = L // 2 and the only tap
    that could cross a batch boundary is the left pad tap at t == 0.
    """
    assert L % 2 == 0
    T = L // 2
    BT, BL = batch * T, batch * L
    r = lax.broadcasted_iota(jnp.int32, (BT, BL), 0)
    c = lax.broadcasted_iota(jnp.int32, (BT, BL), 1)
    diff = c - 2 * r                                  # valid taps: -1, 0, +1
    window = (diff >= -1) & (diff <= 1)
    # Drop the left-pad tap (diff == -1) on the first time-step of every batch
    # element; it would otherwise read the previous batch element's last row.
    first_row = (r == 0)
    for b in range(1, batch):
        first_row = first_row | (r == b * T)
    window = window & jnp.logical_not(first_row & (diff == -1))
    P = jnp.where(window, jnp.float32(1.0 / 3.0), jnp.float32(0.0))
    return jnp.dot(P, acc, preferred_element_type=jnp.float32)   # (B*T, C)


def net_kernel(x_ref, wp_ref, wfc_ref, misc_ref, o_ref):
    """Fused TCN (6 dilated convs + 3 avg-pools + folded BN + ReLU) + FC head.

    x_ref   : (B*32, 128) bf16  flat time-major input, zero-padded to 128 lanes
    wp_ref  : (6*384, 128) bf16 im2col conv weights, BN scale folded in
    wfc_ref : (768, 256)   bf16 rows 0:512 FC0 (time-major, BN-scaled),
                                rows 512:768 FC1 (hidden 64 padded)
    misc_ref: (MISC_ROWS, 256) f32  FC biases / Gway params / conv shifts
    o_ref   : (B, 1) f32
    """
    B = x_ref.shape[0] // HISTORY
    h = x_ref[...]                                   # (B*32, 128) bf16

    mask_cache = {}
    for cfg in LAYER_PLAN:
        d, L, Lo = cfg["d"], cfg["L_in"], cfg["L_out"]
        BL = B * L
        key = (L, d)
        if key not in mask_cache:                    # masks reused by layer pairs
            t1 = lax.broadcasted_iota(jnp.int32, (L, CIN_PAD), 0)
            t = jnp.concatenate([t1] * B, axis=0)    # time index per flat row
            mask_cache[key] = (t >= d, t < L - d)
        ok_l, ok_r = mask_cache[key]

        # im2col taps built by masked shifts of the flat bf16 activation.
        zero = jnp.zeros((), h.dtype)
        zpad = jnp.zeros((d, CIN_PAD), h.dtype)
        hp = jnp.concatenate([zpad, h, zpad], axis=0)            # (BL+2d, 128)
        left = jnp.where(ok_l, hp[0:BL, :], zero)                # x[t-d]
        right = jnp.where(ok_r, hp[2 * d:2 * d + BL, :], zero)   # x[t+d]
        cols = jnp.concatenate([left, h, right], axis=-1)        # (BL, 384) bf16

        w = wp_ref[cfg["w_off"]:cfg["w_off"] + K_IM2COL, :]      # (384, 128) bf16
        acc = jnp.dot(cols, w, preferred_element_type=jnp.float32)  # (BL, 128) f32
        if cfg["pooled"]:
            acc = _avg_pool_flat(acc, B, L)                      # (B*Lo, 128) f32
        sh = misc_ref[cfg["s_off"]:cfg["s_off"] + cfg["s_rows"], 0:CIN_PAD]
        h = jnp.maximum(acc + sh, 0.0).astype(jnp.bfloat16)      # folded BN + ReLU

    # FC head.  BN scales are folded into the weights, biases into misc rows.
    # TODO(synk): nn.Dropout(0.5) is identity in eval mode; train-mode dropout
    # is not implemented.
    h3 = h.reshape(B, L3, CIN_PAD)                               # (B, 4, 128) bf16
    parts = [jnp.dot(h3[:, l, :],
                     wfc_ref[l * CIN_PAD:(l + 1) * CIN_PAD, :],
                     preferred_element_type=jnp.float32)
             for l in range(L3)]                                 # L3 independent dots
    while len(parts) > 1:                                        # tree sum
        nxt = [parts[i] + parts[i + 1] for i in range(0, len(parts) - 1, 2)]
        if len(parts) % 2:
            nxt.append(parts[-1])
        parts = nxt
    h0 = jnp.maximum(parts[0] + misc_ref[0:1, :], 0.0)           # (B, 256)

    h1 = jnp.dot(h0.astype(jnp.bfloat16),
                 wfc_ref[DIM_FC:DIM_FC + 256, :],
                 preferred_element_type=jnp.float32)
    h1 = jnp.maximum(h1 + misc_ref[1:2, :], 0.0)                 # (B, 256)

    out = (jnp.sum(h1 * misc_ref[2:3, :], axis=-1, keepdims=True)
           + misc_ref[3:4, 0:1])
    o_ref[...] = out


def _full_spec(shape):
    zeros = (0,) * len(shape)
    return pl.BlockSpec(shape, lambda i, z=zeros: z)


# ----------------------------------------------------------------------------
# Wrapper
# ----------------------------------------------------------------------------
def net_paper_forward(x_blc, params):
    """x_blc: (B, L, C) channels-last input (transpose of PyTorch NCL)."""
    wpack, wfc, misc = params
    B, L, C = x_blc.shape
    assert B == BATCH and L == HISTORY and C == NUM_INPUTS
    x = jnp.pad(x_blc, ((0, 0), (0, 0), (0, CIN_PAD - C)))       # lane-dense
    x = x.reshape(B * L, CIN_PAD).astype(jnp.bfloat16)           # flat, bf16

    inputs = [x, wpack, wfc, misc]
    return pl.pallas_call(
        net_kernel,
        grid=(1,),
        in_specs=[_full_spec(a.shape) for a in inputs],
        out_specs=_full_spec((B, 1)),
        out_shape=jax.ShapeDtypeStruct((B, 1), jnp.float32),
        compiler_params=pltpu.CompilerParams(dimension_semantics=("arbitrary",)),
    )(*inputs)


# ----------------------------------------------------------------------------
# Deterministic synthetic parameters (+ packed kernel-side layouts)
# ----------------------------------------------------------------------------
def init_params(key):
    keys = iter(jax.random.split(key, 64))

    wpack = np.zeros((WPACK_ROWS, 128), np.float32)
    misc = np.zeros((MISC_ROWS, 256), np.float32)
    ref_convs = []

    for cfg, (cin, cout, d, pooled) in zip(LAYER_PLAN, CONV_SPECS):
        w = jax.random.normal(next(keys), (cout, cin, 3), jnp.float32) * np.sqrt(2.0 / (cin * 3))
        b = 0.1 * jax.random.normal(next(keys), (cout,), jnp.float32)
        gamma = 1.0 + 0.1 * jax.random.normal(next(keys), (cout,), jnp.float32)
        beta = 0.1 * jax.random.normal(next(keys), (cout,), jnp.float32)
        mean = 0.1 * jax.random.normal(next(keys), (cout,), jnp.float32)
        var = 1.0 + 0.1 * jax.random.uniform(next(keys), (cout,), jnp.float32)

        scale = np.asarray(gamma) / np.sqrt(np.asarray(var) + BN_EPS)
        shift = np.asarray(beta) - np.asarray(mean) * scale
        wn, bn_ = np.asarray(w), np.asarray(b)

        # BN scale folded into the im2col conv weight: (Cout,Cin,3)->(3,Cin,Cout).
        w_t = np.transpose(wn, (2, 1, 0)) * scale[None, None, :]
        for k in range(3):
            r0 = cfg["w_off"] + k * CIN_PAD
            wpack[r0:r0 + cin, :cout] = w_t[k]

        # Conv bias + BN shift folded into one per-(time, channel) shift.
        # Pooling is zero-padded (count_include_pad), so the bias passes
        # through with row weight cnt[t] = (#valid taps)/3 (exact).
        L_in, L_out = cfg["L_in"], cfg["L_out"]
        if pooled:
            cnt = np.array([sum(1 for s in (2 * t - 1, 2 * t, 2 * t + 1)
                                if 0 <= s < L_in) for t in range(L_out)],
                           np.float32) / 3.0
        else:
            cnt = np.ones((L_out,), np.float32)
        sh_layer = cnt[:, None] * (scale * bn_)[None, :] + shift[None, :]   # (Lo, cout)
        misc[cfg["s_off"]:cfg["s_off"] + BATCH * L_out, :cout] = np.tile(sh_layer, (BATCH, 1))

        ref_convs.append((w, b, jnp.asarray(scale), jnp.asarray(shift), d, pooled))

    def fc_layer(kin, kout):
        w = jax.random.normal(next(keys), (kout, kin), jnp.float32) * np.sqrt(2.0 / kin)
        b = 0.1 * jax.random.normal(next(keys), (kout,), jnp.float32)
        return w, b

    def bn_stats(n):
        gamma = 1.0 + 0.1 * jax.random.normal(next(keys), (n,), jnp.float32)
        beta = 0.1 * jax.random.normal(next(keys), (n,), jnp.float32)
        mean = 0.1 * jax.random.normal(next(keys), (n,), jnp.float32)
        var = 1.0 + 0.1 * jax.random.uniform(next(keys), (n,), jnp.float32)
        scale = np.asarray(gamma) / np.sqrt(np.asarray(var) + BN_EPS)
        shift = np.asarray(beta) - np.asarray(mean) * scale
        return scale, shift

    w0, b0 = fc_layer(DIM_FC, 256)
    s0, t0 = bn_stats(256)
    w1, b1 = fc_layer(256, 64)
    s1, t1 = bn_stats(64)
    wg, bg = fc_layer(64, 1)

    w0n, w1n, wgn = np.asarray(w0), np.asarray(w1), np.asarray(wg)
    # FC0: torch flattens (B, C, L3) channel-major; permute the weight rows to
    # the kernel's time-major (B, L3, C) layout and fold the BN scale in.
    wfc = np.zeros((DIM_FC + 256, 256), np.float32)
    wfc[:DIM_FC, :] = (np.transpose(w0n.reshape(256, CIN_PAD, L3), (2, 1, 0))
                       .reshape(DIM_FC, 256) * s0[None, :])
    wfc[DIM_FC:DIM_FC + 256, :64] = w1n.T * s1[None, :]          # hidden 64 padded

    misc[0, :] = s0 * np.asarray(b0) + t0
    misc[1, :64] = s1 * np.asarray(b1) + t1
    misc[2, :64] = wgn[0]
    misc[3, 0] = float(np.asarray(bg)[0])

    kernel_params = (
        jnp.asarray(wpack, dtype=jnp.bfloat16),
        jnp.asarray(wfc, dtype=jnp.bfloat16),
        jnp.asarray(misc, dtype=jnp.float32),
    )
    ref_fc = (w0, b0, jnp.asarray(s0), jnp.asarray(t0),
              w1, b1, jnp.asarray(s1), jnp.asarray(t1), wg, bg)
    ref_params = (tuple(ref_convs), ref_fc)
    return kernel_params, ref_params


# ----------------------------------------------------------------------------
# Independent plain-JAX reference (PyTorch NCL semantics) for validation
# ----------------------------------------------------------------------------
def ref_forward(x_ncl, ref_convs, ref_fc):
    hp = lax.Precision.HIGHEST
    h = x_ncl
    for (w, b, scale, shift, d, pooled) in ref_convs:
        h = lax.conv_general_dilated(
            h, w, window_strides=(1,), padding=[(d, d)], rhs_dilation=(d,),
            dimension_numbers=("NCH", "OIH", "NCH"), precision=hp)
        h = h + b[None, :, None]
        if pooled:   # AvgPool1d(3, 2, 1) with count_include_pad=True
            h = lax.reduce_window(h, 0.0, lax.add, (1, 1, 3), (1, 1, 2),
                                  ((0, 0), (0, 0), (1, 1))) / 3.0
        h = jnp.maximum(h * scale[None, :, None] + shift[None, :, None], 0.0)
    flat = h.reshape(h.shape[0], -1)            # torch x.flatten(1)
    (w0, b0, s0, t0, w1, b1, s1, t1, wg, bg) = ref_fc
    z = jnp.dot(flat, w0.T, precision=hp) + b0
    z = jnp.maximum(z * s0 + t0, 0.0)
    z = jnp.dot(z, w1.T, precision=hp) + b1
    z = jnp.maximum(z * s1 + t1, 0.0)
    return jnp.dot(z, wg.T, precision=hp) + bg


if __name__ == "__main__":
    root = jax.random.PRNGKey(0)
    k_x, k_p = jax.random.split(root)
    # PyTorch-layout input: (batch, num_inputs, history_signal)
    x_ncl = jax.random.normal(k_x, (BATCH, NUM_INPUTS, HISTORY), jnp.float32)
    kernel_params, ref_params = init_params(k_p)

    x_blc = jnp.transpose(x_ncl, (0, 2, 1))     # channels-last for the kernel
    fwd = jax.jit(net_paper_forward)
    out = jax.block_until_ready(fwd(x_blc, kernel_params))

    ref = jax.block_until_ready(ref_forward(x_ncl, *ref_params))
    assert out.shape == (BATCH, 1), out.shape
    # bf16 matmul operands (f32 accumulation) vs an all-f32 reference: expected
    # drift across the ~9 chained matmul layers; 2e-2 documents that drift.
    if not np.allclose(np.asarray(out), np.asarray(ref), rtol=2e-2, atol=2e-2):
        err = float(jnp.max(jnp.abs(out - ref)))
        raise AssertionError(f"Pallas output mismatch vs reference (max abs err {err})")
    print("KERNEL_OK")
</pallas_src>

<mosaic_0001>
module attributes {stable_mosaic.version = 11 : i64} {
  func.func @net_kernel(%arg0: i32, %arg1: memref<64x128xbf16, #tpu.memory_space<vmem>>, %arg2: memref<2304x128xbf16, #tpu.memory_space<vmem>>, %arg3: memref<768x256xbf16, #tpu.memory_space<vmem>>, %arg4: memref<176x256xf32, #tpu.memory_space<vmem>>, %arg5: memref<2x1xf32, #tpu.memory_space<vmem>>) attributes {dimension_semantics = [#tpu.dimension_semantics<arbitrary>], iteration_bounds = array<i64: 1>, scalar_prefetch = 0 : i64, scratch_operands = 0 : i64, tpu.core_type = #tpu.core_type<tc>, window_params = [{pipeline_mode = #tpu.pipeline_mode<synchronous>, transform_indices = @transform_0, window_bounds = array<i64: 64, 128>}, {pipeline_mode = #tpu.pipeline_mode<synchronous>, transform_indices = @transform_1, window_bounds = array<i64: 2304, 128>}, {pipeline_mode = #tpu.pipeline_mode<synchronous>, transform_indices = @transform_2, window_bounds = array<i64: 768, 256>}, {pipeline_mode = #tpu.pipeline_mode<synchronous>, transform_indices = @transform_3, window_bounds = array<i64: 176, 256>}, {pipeline_mode = #tpu.pipeline_mode<synchronous>, transform_indices = @transform_4, window_bounds = array<i64: 2, 1>}]} {
    %c0 = arith.constant 0 : index
    %c0_0 = arith.constant 0 : index
    %0 = vector.load %arg1[%c0, %c0_0] : memref<64x128xbf16, #tpu.memory_space<vmem>>, vector<64x128xbf16>
    %1 = tpu.iota {dimensions = array<i32: 0>} : vector<32x128xi32>
    %2 = tpu.concatenate %1, %1 in 0 : vector<32x128xi32>, vector<32x128xi32> -> vector<64x128xi32>
    %c2_i32 = arith.constant 2 : i32
    %3 = vector.broadcast %c2_i32 : i32 to vector<64x128xi32>
    %4 = arith.cmpi sge, %2, %3 : vector<64x128xi32>
    %c30_i32 = arith.constant 30 : i32
    %5 = vector.broadcast %c30_i32 : i32 to vector<64x128xi32>
    %6 = arith.cmpi slt, %2, %5 : vector<64x128xi32>
    %cst = arith.constant 0.000000e+00 : bf16
    %7 = vector.broadcast %cst : bf16 to vector<2x128xbf16>
    %8 = tpu.concatenate %7, %0, %7 in 0 : vector<2x128xbf16>, vector<64x128xbf16>, vector<2x128xbf16> -> vector<68x128xbf16>
    %9 = vector.extract_strided_slice %8 {offsets = [0, 0], sizes = [64, 128], strides = [1, 1]} : vector<68x128xbf16> to vector<64x128xbf16>
    %cst_1 = arith.constant 0.000000e+00 : bf16
    %10 = vector.broadcast %cst_1 : bf16 to vector<64x128xbf16>
    %11 = arith.select %4, %9, %10 : vector<64x128xi1>, vector<64x128xbf16>
    %12 = vector.extract_strided_slice %8 {offsets = [4, 0], sizes = [64, 128], strides = [1, 1]} : vector<68x128xbf16> to vector<64x128xbf16>
    %cst_2 = arith.constant 0.000000e+00 : bf16
    %13 = vector.broadcast %cst_2 : bf16 to vector<64x128xbf16>
    %14 = arith.select %6, %12, %13 : vector<64x128xi1>, vector<64x128xbf16>
    %15 = tpu.concatenate %11, %0, %14 in 1 : vector<64x128xbf16>, vector<64x128xbf16>, vector<64x128xbf16> -> vector<64x384xbf16>
    %c0_3 = arith.constant 0 : index
    %c0_4 = arith.constant 0 : index
    %16 = vector.load %arg2[%c0_3, %c0_4] : memref<2304x128xbf16, #tpu.memory_space<vmem>>, vector<384x128xbf16>
    %cst_5 = arith.constant dense<0.000000e+00> : vector<64x128xf32>
    %17 = tpu.matmul %15, %16, %cst_5 {dimension_numbers = #tpu.dot_dimension_numbers<[1], [0], [0], [1], [0, 0, 1, 1], [], []>} : vector<64x384xbf16>, vector<384x128xbf16>, vector<64x128xf32> -> vector<64x128xf32>
    %c8 = arith.constant 8 : index
    %c0_6 = arith.constant 0 : index
    %18 = vector.load %arg4[%c8, %c0_6] : memref<176x256xf32, #tpu.memory_space<vmem>>, vector<64x128xf32>
    %19 = arith.addf %17, %18 : vector<64x128xf32>
    %cst_7 = arith.constant 0.000000e+00 : f32
    %20 = vector.broadcast %cst_7 : f32 to vector<64x128xf32>
    %21 = arith.maximumf %19, %20 : vector<64x128xf32>
    %22 = arith.truncf %21 : vector<64x128xf32> to vector<64x128xbf16>
    %cst_8 = arith.constant 0.000000e+00 : bf16
    %23 = vector.broadcast %cst_8 : bf16 to vector<2x128xbf16>
    %24 = tpu.concatenate %23, %22, %23 in 0 : vector<2x128xbf16>, vector<64x128xbf16>, vector<2x128xbf16> -> vector<68x128xbf16>
    %25 = vector.extract_strided_slice %24 {offsets = [0, 0], sizes = [64, 128], strides = [1, 1]} : vector<68x128xbf16> to vector<64x128xbf16>
    %cst_9 = arith.constant 0.000000e+00 : bf16
    %26 = vector.broadcast %cst_9 : bf16 to vector<64x128xbf16>
    %27 = arith.select %4, %25, %26 : vector<64x128xi1>, vector<64x128xbf16>
    %28 = vector.extract_strided_slice %24 {offsets = [4, 0], sizes = [64, 128], strides = [1, 1]} : vector<68x128xbf16> to vector<64x128xbf16>
    %cst_10 = arith.constant 0.000000e+00 : bf16
    %29 = vector.broadcast %cst_10 : bf16 to vector<64x128xbf16>
    %30 = arith.select %6, %28, %29 : vector<64x128xi1>, vector<64x128xbf16>
    %31 = tpu.concatenate %27, %22, %30 in 1 : vector<64x128xbf16>, vector<64x128xbf16>, vector<64x128xbf16> -> vector<64x384xbf16>
    %c384 = arith.constant 384 : index
    %c0_11 = arith.constant 0 : index
    %32 = vector.load %arg2[%c384, %c0_11] : memref<2304x128xbf16, #tpu.memory_space<vmem>>, vector<384x128xbf16>
    %cst_12 = arith.constant dense<0.000000e+00> : vector<64x128xf32>
    %33 = tpu.matmul %31, %32, %cst_12 {dimension_numbers = #tpu.dot_dimension_numbers<[1], [0], [0], [1], [0, 0, 1, 1], [], []>} : vector<64x384xbf16>, vector<384x128xbf16>, vector<64x128xf32> -> vector<64x128xf32>
    %34 = tpu.iota {dimensions = array<i32: 0>} : vector<32x64xi32>
    %35 = tpu.iota {dimensions = array<i32: 1>} : vector<32x64xi32>
    %c2_i32_13 = arith.constant 2 : i32
    %36 = vector.broadcast %c2_i32_13 : i32 to vector<32x64xi32>
    %37 = arith.muli %36, %34 : vector<32x64xi32>
    %38 = arith.subi %35, %37 : vector<32x64xi32>
    %c-1_i32 = arith.constant -1 : i32
    %39 = vector.broadcast %c-1_i32 : i32 to vector<32x64xi32>
    %40 = arith.cmpi sge, %38, %39 : vector<32x64xi32>
    %c1_i32 = arith.constant 1 : i32
    %41 = vector.broadcast %c1_i32 : i32 to vector<32x64xi32>
    %42 = arith.cmpi sle, %38, %41 : vector<32x64xi32>
    %43 = arith.andi %40, %42 : vector<32x64xi1>
    %c0_i32 = arith.constant 0 : i32
    %44 = vector.broadcast %c0_i32 : i32 to vector<32x64xi32>
    %45 = arith.cmpi eq, %34, %44 : vector<32x64xi32>
    %c16_i32 = arith.constant 16 : i32
    %46 = vector.broadcast %c16_i32 : i32 to vector<32x64xi32>
    %47 = arith.cmpi eq, %34, %46 : vector<32x64xi32>
    %48 = arith.ori %45, %47 : vector<32x64xi1>
    %c-1_i32_14 = arith.constant -1 : i32
    %49 = vector.broadcast %c-1_i32_14 : i32 to vector<32x64xi32>
    %50 = arith.cmpi eq, %38, %49 : vector<32x64xi32>
    %51 = arith.andi %48, %50 : vector<32x64xi1>
    %cst_15 = arith.constant dense<true> : vector<32x64xi1>
    %52 = arith.xori %51, %cst_15 : vector<32x64xi1>
    %53 = arith.andi %43, %52 : vector<32x64xi1>
    %cst_16 = arith.constant 0.333333343 : f32
    %cst_17 = arith.constant 0.000000e+00 : f32
    %54 = vector.broadcast %cst_16 : f32 to vector<32x64xf32>
    %55 = vector.broadcast %cst_17 : f32 to vector<32x64xf32>
    %56 = arith.select %53, %54, %55 : vector<32x64xi1>, vector<32x64xf32>
    %cst_18 = arith.constant dense<0.000000e+00> : vector<32x128xf32>
    %57 = tpu.matmul %56, %33, %cst_18 {dimension_numbers = #tpu.dot_dimension_numbers<[1], [0], [0], [1], [0, 0, 1, 1], [], []>} : vector<32x64xf32>, vector<64x128xf32>, vector<32x128xf32> -> vector<32x128xf32>
    %c72 = arith.constant 72 : index
    %c0_19 = arith.constant 0 : index
    %58 = vector.load %arg4[%c72, %c0_19] : memref<176x256xf32, #tpu.memory_space<vmem>>, vector<32x128xf32>
    %59 = arith.addf %57, %58 : vector<32x128xf32>
    %cst_20 = arith.constant 0.000000e+00 : f32
    %60 = vector.broadcast %cst_20 : f32 to vector<32x128xf32>
    %61 = arith.maximumf %59, %60 : vector<32x128xf32>
    %62 = arith.truncf %61 : vector<32x128xf32> to vector<32x128xbf16>
    %63 = tpu.iota {dimensions = array<i32: 0>} : vector<16x128xi32>
    %64 = tpu.concatenate %63, %63 in 0 : vector<16x128xi32>, vector<16x128xi32> -> vector<32x128xi32>
    %c2_i32_21 = arith.constant 2 : i32
    %65 = vector.broadcast %c2_i32_21 : i32 to vector<32x128xi32>
    %66 = arith.cmpi sge, %64, %65 : vector<32x128xi32>
    %c14_i32 = arith.constant 14 : i32
    %67 = vector.broadcast %c14_i32 : i32 to vector<32x128xi32>
    %68 = arith.cmpi slt, %64, %67 : vector<32x128xi32>
    %cst_22 = arith.constant 0.000000e+00 : bf16
    %69 = vector.broadcast %cst_22 : bf16 to vector<2x128xbf16>
    %70 = tpu.concatenate %69, %62, %69 in 0 : vector<2x128xbf16>, vector<32x128xbf16>, vector<2x128xbf16> -> vector<36x128xbf16>
    %71 = vector.extract_strided_slice %70 {offsets = [0, 0], sizes = [32, 128], strides = [1, 1]} : vector<36x128xbf16> to vector<32x128xbf16>
    %cst_23 = arith.constant 0.000000e+00 : bf16
    %72 = vector.broadcast %cst_23 : bf16 to vector<32x128xbf16>
    %73 = arith.select %66, %71, %72 : vector<32x128xi1>, vector<32x128xbf16>
    %74 = vector.extract_strided_slice %70 {offsets = [4, 0], sizes = [32, 128], strides = [1, 1]} : vector<36x128xbf16> to vector<32x128xbf16>
    %cst_24 = arith.constant 0.000000e+00 : bf16
    %75 = vector.broadcast %cst_24 : bf16 to vector<32x128xbf16>
    %76 = arith.select %68, %74, %75 : vector<32x128xi1>, vector<32x128xbf16>
    %77 = tpu.concatenate %73, %62, %76 in 1 : vector<32x128xbf16>, vector<32x128xbf16>, vector<32x128xbf16> -> vector<32x384xbf16>
    %c768 = arith.constant 768 : index
    %c0_25 = arith.constant 0 : index
    %78 = vector.load %arg2[%c768, %c0_25] : memref<2304x128xbf16, #tpu.memory_space<vmem>>, vector<384x128xbf16>
    %cst_26 = arith.constant dense<0.000000e+00> : vector<32x128xf32>
    %79 = tpu.matmul %77, %78, %cst_26 {dimension_numbers = #tpu.dot_dimension_numbers<[1], [0], [0], [1], [0, 0, 1, 1], [], []>} : vector<32x384xbf16>, vector<384x128xbf16>, vector<32x128xf32> -> vector<32x128xf32>
    %c104 = arith.constant 104 : index
    %c0_27 = arith.constant 0 : index
    %80 = vector.load %arg4[%c104, %c0_27] : memref<176x256xf32, #tpu.memory_space<vmem>>, vector<32x128xf32>
    %81 = arith.addf %79, %80 : vector<32x128xf32>
    %cst_28 = arith.constant 0.000000e+00 : f32
    %82 = vector.broadcast %cst_28 : f32 to vector<32x128xf32>
    %83 = arith.maximumf %81, %82 : vector<32x128xf32>
    %84 = arith.truncf %83 : vector<32x128xf32> to vector<32x128xbf16>
    %cst_29 = arith.constant 0.000000e+00 : bf16
    %85 = vector.broadcast %cst_29 : bf16 to vector<2x128xbf16>
    %86 = tpu.concatenate %85, %84, %85 in 0 : vector<2x128xbf16>, vector<32x128xbf16>, vector<2x128xbf16> -> vector<36x128xbf16>
    %87 = vector.extract_strided_slice %86 {offsets = [0, 0], sizes = [32, 128], strides = [1, 1]} : vector<36x128xbf16> to vector<32x128xbf16>
    %cst_30 = arith.constant 0.000000e+00 : bf16
    %88 = vector.broadcast %cst_30 : bf16 to vector<32x128xbf16>
    %89 = arith.select %66, %87, %88 : vector<32x128xi1>, vector<32x128xbf16>
    %90 = vector.extract_strided_slice %86 {offsets = [4, 0], sizes = [32, 128], strides = [1, 1]} : vector<36x128xbf16> to vector<32x128xbf16>
    %cst_31 = arith.constant 0.000000e+00 : bf16
    %91 = vector.broadcast %cst_31 : bf16 to vector<32x128xbf16>
    %92 = arith.select %68, %90, %91 : vector<32x128xi1>, vector<32x128xbf16>
    %93 = tpu.concatenate %89, %84, %92 in 1 : vector<32x128xbf16>, vector<32x128xbf16>, vector<32x128xbf16> -> vector<32x384xbf16>
    %c1152 = arith.constant 1152 : index
    %c0_32 = arith.constant 0 : index
    %94 = vector.load %arg2[%c1152, %c0_32] : memref<2304x128xbf16, #tpu.memory_space<vmem>>, vector<384x128xbf16>
    %cst_33 = arith.constant dense<0.000000e+00> : vector<32x128xf32>
    %95 = tpu.matmul %93, %94, %cst_33 {dimension_numbers = #tpu.dot_dimension_numbers<[1], [0], [0], [1], [0, 0, 1, 1], [], []>} : vector<32x384xbf16>, vector<384x128xbf16>, vector<32x128xf32> -> vector<32x128xf32>
    %96 = tpu.iota {dimensions = array<i32: 0>} : vector<16x32xi32>
    %97 = tpu.iota {dimensions = array<i32: 1>} : vector<16x32xi32>
    %c2_i32_34 = arith.constant 2 : i32
    %98 = vector.broadcast %c2_i32_34 : i32 to vector<16x32xi32>
    %99 = arith.muli %98, %96 : vector<16x32xi32>
    %100 = arith.subi %97, %99 : vector<16x32xi32>
    %c-1_i32_35 = arith.constant -1 : i32
    %101 = vector.broadcast %c-1_i32_35 : i32 to vector<16x32xi32>
    %102 = arith.cmpi sge, %100, %101 : vector<16x32xi32>
    %c1_i32_36 = arith.constant 1 : i32
    %103 = vector.broadcast %c1_i32_36 : i32 to vector<16x32xi32>
    %104 = arith.cmpi sle, %100, %103 : vector<16x32xi32>
    %105 = arith.andi %102, %104 : vector<16x32xi1>
    %c0_i32_37 = arith.constant 0 : i32
    %106 = vector.broadcast %c0_i32_37 : i32 to vector<16x32xi32>
    %107 = arith.cmpi eq, %96, %106 : vector<16x32xi32>
    %c8_i32 = arith.constant 8 : i32
    %108 = vector.broadcast %c8_i32 : i32 to vector<16x32xi32>
    %109 = arith.cmpi eq, %96, %108 : vector<16x32xi32>
    %110 = arith.ori %107, %109 : vector<16x32xi1>
    %c-1_i32_38 = arith.constant -1 : i32
    %111 = vector.broadcast %c-1_i32_38 : i32 to vector<16x32xi32>
    %112 = arith.cmpi eq, %100, %111 : vector<16x32xi32>
    %113 = arith.andi %110, %112 : vector<16x32xi1>
    %cst_39 = arith.constant dense<true> : vector<16x32xi1>
    %114 = arith.xori %113, %cst_39 : vector<16x32xi1>
    %115 = arith.andi %105, %114 : vector<16x32xi1>
    %cst_40 = arith.constant 0.333333343 : f32
    %cst_41 = arith.constant 0.000000e+00 : f32
    %116 = vector.broadcast %cst_40 : f32 to vector<16x32xf32>
    %117 = vector.broadcast %cst_41 : f32 to vector<16x32xf32>
    %118 = arith.select %115, %116, %117 : vector<16x32xi1>, vector<16x32xf32>
    %cst_42 = arith.constant dense<0.000000e+00> : vector<16x128xf32>
    %119 = tpu.matmul %118, %95, %cst_42 {dimension_numbers = #tpu.dot_dimension_numbers<[1], [0], [0], [1], [0, 0, 1, 1], [], []>} : vector<16x32xf32>, vector<32x128xf32>, vector<16x128xf32> -> vector<16x128xf32>
    %c136 = arith.constant 136 : index
    %c0_43 = arith.constant 0 : index
    %120 = vector.load %arg4[%c136, %c0_43] : memref<176x256xf32, #tpu.memory_space<vmem>>, vector<16x128xf32>
    %121 = arith.addf %119, %120 : vector<16x128xf32>
    %cst_44 = arith.constant 0.000000e+00 : f32
    %122 = vector.broadcast %cst_44 : f32 to vector<16x128xf32>
    %123 = arith.maximumf %121, %122 : vector<16x128xf32>
    %124 = arith.truncf %123 : vector<16x128xf32> to vector<16x128xbf16>
    %125 = tpu.iota {dimensions = array<i32: 0>} : vector<8x128xi32>
    %126 = tpu.concatenate %125, %125 in 0 : vector<8x128xi32>, vector<8x128xi32> -> vector<16x128xi32>
    %c4_i32 = arith.constant 4 : i32
    %127 = vector.broadcast %c4_i32 : i32 to vector<16x128xi32>
    %128 = arith.cmpi sge, %126, %127 : vector<16x128xi32>
    %c4_i32_45 = arith.constant 4 : i32
    %129 = vector.broadcast %c4_i32_45 : i32 to vector<16x128xi32>
    %130 = arith.cmpi slt, %126, %129 : vector<16x128xi32>
    %cst_46 = arith.constant 0.000000e+00 : bf16
    %131 = vector.broadcast %cst_46 : bf16 to vector<4x128xbf16>
    %132 = tpu.concatenate %131, %124, %131 in 0 : vector<4x128xbf16>, vector<16x128xbf16>, vector<4x128xbf16> -> vector<24x128xbf16>
    %133 = vector.extract_strided_slice %132 {offsets = [0, 0], sizes = [16, 128], strides = [1, 1]} : vector<24x128xbf16> to vector<16x128xbf16>
    %cst_47 = arith.constant 0.000000e+00 : bf16
    %134 = vector.broadcast %cst_47 : bf16 to vector<16x128xbf16>
    %135 = arith.select %128, %133, %134 : vector<16x128xi1>, vector<16x128xbf16>
    %136 = vector.extract_strided_slice %132 {offsets = [8, 0], sizes = [16, 128], strides = [1, 1]} : vector<24x128xbf16> to vector<16x128xbf16>
    %cst_48 = arith.constant 0.000000e+00 : bf16
    %137 = vector.broadcast %cst_48 : bf16 to vector<16x128xbf16>
    %138 = arith.select %130, %136, %137 : vector<16x128xi1>, vector<16x128xbf16>
    %139 = tpu.concatenate %135, %124, %138 in 1 : vector<16x128xbf16>, vector<16x128xbf16>, vector<16x128xbf16> -> vector<16x384xbf16>
    %c1536 = arith.constant 1536 : index
    %c0_49 = arith.constant 0 : index
    %140 = vector.load %arg2[%c1536, %c0_49] : memref<2304x128xbf16, #tpu.memory_space<vmem>>, vector<384x128xbf16>
    %cst_50 = arith.constant dense<0.000000e+00> : vector<16x128xf32>
    %141 = tpu.matmul %139, %140, %cst_50 {dimension_numbers = #tpu.dot_dimension_numbers<[1], [0], [0], [1], [0, 0, 1, 1], [], []>} : vector<16x384xbf16>, vector<384x128xbf16>, vector<16x128xf32> -> vector<16x128xf32>
    %c152 = arith.constant 152 : index
    %c0_51 = arith.constant 0 : index
    %142 = vector.load %arg4[%c152, %c0_51] : memref<176x256xf32, #tpu.memory_space<vmem>>, vector<16x128xf32>
    %143 = arith.addf %141, %142 : vector<16x128xf32>
    %cst_52 = arith.constant 0.000000e+00 : f32
    %144 = vector.broadcast %cst_52 : f32 to vector<16x128xf32>
    %145 = arith.maximumf %143, %144 : vector<16x128xf32>
    %146 = arith.truncf %145 : vector<16x128xf32> to vector<16x128xbf16>
    %cst_53 = arith.constant 0.000000e+00 : bf16
    %147 = vector.broadcast %cst_53 : bf16 to vector<4x128xbf16>
    %148 = tpu.concatenate %147, %146, %147 in 0 : vector<4x128xbf16>, vector<16x128xbf16>, vector<4x128xbf16> -> vector<24x128xbf16>
    %149 = vector.extract_strided_slice %148 {offsets = [0, 0], sizes = [16, 128], strides = [1, 1]} : vector<24x128xbf16> to vector<16x128xbf16>
    %cst_54 = arith.constant 0.000000e+00 : bf16
    %150 = vector.broadcast %cst_54 : bf16 to vector<16x128xbf16>
    %151 = arith.select %128, %149, %150 : vector<16x128xi1>, vector<16x128xbf16>
    %152 = vector.extract_strided_slice %148 {offsets = [8, 0], sizes = [16, 128], strides = [1, 1]} : vector<24x128xbf16> to vector<16x128xbf16>
    %cst_55 = arith.constant 0.000000e+00 : bf16
    %153 = vector.broadcast %cst_55 : bf16 to vector<16x128xbf16>
    %154 = arith.select %130, %152, %153 : vector<16x128xi1>, vector<16x128xbf16>
    %155 = tpu.concatenate %151, %146, %154 in 1 : vector<16x128xbf16>, vector<16x128xbf16>, vector<16x128xbf16> -> vector<16x384xbf16>
    %c1920 = arith.constant 1920 : index
    %c0_56 = arith.constant 0 : index
    %156 = vector.load %arg2[%c1920, %c0_56] : memref<2304x128xbf16, #tpu.memory_space<vmem>>, vector<384x128xbf16>
    %cst_57 = arith.constant dense<0.000000e+00> : vector<16x128xf32>
    %157 = tpu.matmul %155, %156, %cst_57 {dimension_numbers = #tpu.dot_dimension_numbers<[1], [0], [0], [1], [0, 0, 1, 1], [], []>} : vector<16x384xbf16>, vector<384x128xbf16>, vector<16x128xf32> -> vector<16x128xf32>
    %158 = tpu.iota {dimensions = array<i32: 0>} : vector<8x16xi32>
    %159 = tpu.iota {dimensions = array<i32: 1>} : vector<8x16xi32>
    %c2_i32_58 = arith.constant 2 : i32
    %160 = vector.broadcast %c2_i32_58 : i32 to vector<8x16xi32>
    %161 = arith.muli %160, %158 : vector<8x16xi32>
    %162 = arith.subi %159, %161 : vector<8x16xi32>
    %c-1_i32_59 = arith.constant -1 : i32
    %163 = vector.broadcast %c-1_i32_59 : i32 to vector<8x16xi32>
    %164 = arith.cmpi sge, %162, %163 : vector<8x16xi32>
    %c1_i32_60 = arith.constant 1 : i32
    %165 = vector.broadcast %c1_i32_60 : i32 to vector<8x16xi32>
    %166 = arith.cmpi sle, %162, %165 : vector<8x16xi32>
    %167 = arith.andi %164, %166 : vector<8x16xi1>
    %c0_i32_61 = arith.constant 0 : i32
    %168 = vector.broadcast %c0_i32_61 : i32 to vector<8x16xi32>
    %169 = arith.cmpi eq, %158, %168 : vector<8x16xi32>
    %c4_i32_62 = arith.constant 4 : i32
    %170 = vector.broadcast %c4_i32_62 : i32 to vector<8x16xi32>
    %171 = arith.cmpi eq, %158, %170 : vector<8x16xi32>
    %172 = arith.ori %169, %171 : vector<8x16xi1>
    %c-1_i32_63 = arith.constant -1 : i32
    %173 = vector.broadcast %c-1_i32_63 : i32 to vector<8x16xi32>
    %174 = arith.cmpi eq, %162, %173 : vector<8x16xi32>
    %175 = arith.andi %172, %174 : vector<8x16xi1>
    %cst_64 = arith.constant dense<true> : vector<8x16xi1>
    %176 = arith.xori %175, %cst_64 : vector<8x16xi1>
    %177 = arith.andi %167, %176 : vector<8x16xi1>
    %cst_65 = arith.constant 0.333333343 : f32
    %cst_66 = arith.constant 0.000000e+00 : f32
    %178 = vector.broadcast %cst_65 : f32 to vector<8x16xf32>
    %179 = vector.broadcast %cst_66 : f32 to vector<8x16xf32>
    %180 = arith.select %177, %178, %179 : vector<8x16xi1>, vector<8x16xf32>
    %cst_67 = arith.constant dense<0.000000e+00> : vector<8x128xf32>
    %181 = tpu.matmul %180, %157, %cst_67 {dimension_numbers = #tpu.dot_dimension_numbers<[1], [0], [0], [1], [0, 0, 1, 1], [], []>} : vector<8x16xf32>, vector<16x128xf32>, vector<8x128xf32> -> vector<8x128xf32>
    %c168 = arith.constant 168 : index
    %c0_68 = arith.constant 0 : index
    %182 = vector.load %arg4[%c168, %c0_68] : memref<176x256xf32, #tpu.memory_space<vmem>>, vector<8x128xf32>
    %183 = arith.addf %181, %182 : vector<8x128xf32>
    %cst_69 = arith.constant 0.000000e+00 : f32
    %184 = vector.broadcast %cst_69 : f32 to vector<8x128xf32>
    %185 = arith.maximumf %183, %184 : vector<8x128xf32>
    %186 = arith.truncf %185 : vector<8x128xf32> to vector<8x128xbf16>
    %187 = vector.shape_cast %186 : vector<8x128xbf16> to vector<2x4x128xbf16>
    %188 = vector.extract_strided_slice %187 {offsets = [0, 0, 0], sizes = [2, 1, 128], strides = [1, 1, 1]} : vector<2x4x128xbf16> to vector<2x1x128xbf16>
    %189 = vector.shape_cast %188 : vector<2x1x128xbf16> to vector<2x128xbf16>
    %c0_70 = arith.constant 0 : index
    %c0_71 = arith.constant 0 : index
    %190 = vector.load %arg3[%c0_70, %c0_71] : memref<768x256xbf16, #tpu.memory_space<vmem>>, vector<128x256xbf16>
    %cst_72 = arith.constant dense<0.000000e+00> : vector<2x256xf32>
    %191 = tpu.matmul %189, %190, %cst_72 {dimension_numbers = #tpu.dot_dimension_numbers<[1], [0], [0], [1], [0, 0, 1, 1], [], []>} : vector<2x128xbf16>, vector<128x256xbf16>, vector<2x256xf32> -> vector<2x256xf32>
    %192 = vector.extract_strided_slice %187 {offsets = [0, 1, 0], sizes = [2, 1, 128], strides = [1, 1, 1]} : vector<2x4x128xbf16> to vector<2x1x128xbf16>
    %193 = vector.shape_cast %192 : vector<2x1x128xbf16> to vector<2x128xbf16>
    %c128 = arith.constant 128 : index
    %c0_73 = arith.constant 0 : index
    %194 = vector.load %arg3[%c128, %c0_73] : memref<768x256xbf16, #tpu.memory_space<vmem>>, vector<128x256xbf16>
    %cst_74 = arith.constant dense<0.000000e+00> : vector<2x256xf32>
    %195 = tpu.matmul %193, %194, %cst_74 {dimension_numbers = #tpu.dot_dimension_numbers<[1], [0], [0], [1], [0, 0, 1, 1], [], []>} : vector<2x128xbf16>, vector<128x256xbf16>, vector<2x256xf32> -> vector<2x256xf32>
    %196 = vector.extract_strided_slice %187 {offsets = [0, 2, 0], sizes = [2, 1, 128], strides = [1, 1, 1]} : vector<2x4x128xbf16> to vector<2x1x128xbf16>
    %197 = vector.shape_cast %196 : vector<2x1x128xbf16> to vector<2x128xbf16>
    %c256 = arith.constant 256 : index
    %c0_75 = arith.constant 0 : index
    %198 = vector.load %arg3[%c256, %c0_75] : memref<768x256xbf16, #tpu.memory_space<vmem>>, vector<128x256xbf16>
    %cst_76 = arith.constant dense<0.000000e+00> : vector<2x256xf32>
    %199 = tpu.matmul %197, %198, %cst_76 {dimension_numbers = #tpu.dot_dimension_numbers<[1], [0], [0], [1], [0, 0, 1, 1], [], []>} : vector<2x128xbf16>, vector<128x256xbf16>, vector<2x256xf32> -> vector<2x256xf32>
    %200 = vector.extract_strided_slice %187 {offsets = [0, 3, 0], sizes = [2, 1, 128], strides = [1, 1, 1]} : vector<2x4x128xbf16> to vector<2x1x128xbf16>
    %201 = vector.shape_cast %200 : vector<2x1x128xbf16> to vector<2x128xbf16>
    %c384_77 = arith.constant 384 : index
    %c0_78 = arith.constant 0 : index
    %202 = vector.load %arg3[%c384_77, %c0_78] : memref<768x256xbf16, #tpu.memory_space<vmem>>, vector<128x256xbf16>
    %cst_79 = arith.constant dense<0.000000e+00> : vector<2x256xf32>
    %203 = tpu.matmul %201, %202, %cst_79 {dimension_numbers = #tpu.dot_dimension_numbers<[1], [0], [0], [1], [0, 0, 1, 1], [], []>} : vector<2x128xbf16>, vector<128x256xbf16>, vector<2x256xf32> -> vector<2x256xf32>
    %204 = arith.addf %191, %195 : vector<2x256xf32>
    %205 = arith.addf %199, %203 : vector<2x256xf32>
    %206 = arith.addf %204, %205 : vector<2x256xf32>
    %c0_80 = arith.constant 0 : index
    %c0_81 = arith.constant 0 : index
    %207 = vector.load %arg4[%c0_80, %c0_81] : memref<176x256xf32, #tpu.memory_space<vmem>>, vector<1x256xf32>
    %208 = vector.broadcast %207 : vector<1x256xf32> to vector<2x256xf32>
    %209 = arith.addf %206, %208 : vector<2x256xf32>
    %cst_82 = arith.constant 0.000000e+00 : f32
    %210 = vector.broadcast %cst_82 : f32 to vector<2x256xf32>
    %211 = arith.maximumf %209, %210 : vector<2x256xf32>
    %212 = arith.truncf %211 : vector<2x256xf32> to vector<2x256xbf16>
    %c512 = arith.constant 512 : index
    %c0_83 = arith.constant 0 : index
    %213 = vector.load %arg3[%c512, %c0_83] : memref<768x256xbf16, #tpu.memory_space<vmem>>, vector<256x256xbf16>
    %cst_84 = arith.constant dense<0.000000e+00> : vector<2x256xf32>
    %214 = tpu.matmul %212, %213, %cst_84 {dimension_numbers = #tpu.dot_dimension_numbers<[1], [0], [0], [1], [0, 0, 1, 1], [], []>} : vector<2x256xbf16>, vector<256x256xbf16>, vector<2x256xf32> -> vector<2x256xf32>
    %c1 = arith.constant 1 : index
    %c0_85 = arith.constant 0 : index
    %215 = vector.load %arg4[%c1, %c0_85] : memref<176x256xf32, #tpu.memory_space<vmem>>, vector<1x256xf32>
    %216 = vector.broadcast %215 : vector<1x256xf32> to vector<2x256xf32>
    %217 = arith.addf %214, %216 : vector<2x256xf32>
    %cst_86 = arith.constant 0.000000e+00 : f32
    %218 = vector.broadcast %cst_86 : f32 to vector<2x256xf32>
    %219 = arith.maximumf %217, %218 : vector<2x256xf32>
    %c2 = arith.constant 2 : index
    %c0_87 = arith.constant 0 : index
    %220 = vector.load %arg4[%c2, %c0_87] : memref<176x256xf32, #tpu.memory_space<vmem>>, vector<1x256xf32>
    %221 = vector.broadcast %220 : vector<1x256xf32> to vector<2x256xf32>
    %222 = arith.mulf %219, %221 : vector<2x256xf32>
    %cst_88 = arith.constant dense<0.000000e+00> : vector<2xf32>
    %223 = vector.multi_reduction <add>, %222, %cst_88 [1] : vector<2x256xf32> to vector<2xf32>
    %224 = vector.shape_cast %223 : vector<2xf32> to vector<2x1xf32>
    %c3 = arith.constant 3 : index
    %c0_89 = arith.constant 0 : index
    %225 = vector.load %arg4[%c3, %c0_89] : memref<176x256xf32, #tpu.memory_space<vmem>>, vector<1x1xf32>
    %226 = vector.broadcast %225 : vector<1x1xf32> to vector<2x1xf32>
    %227 = arith.addf %224, %226 : vector<2x1xf32>
    %c0_90 = arith.constant 0 : index
    %c0_91 = arith.constant 0 : index
    %228 = vector.load %arg5[%c0_90, %c0_91] : memref<2x1xf32, #tpu.memory_space<vmem>>, vector<2x1xf32>
    tpu.vector_store %arg5[%c0_90, %c0_91], %227 {strides = array<i32>} : memref<2x1xf32, #tpu.memory_space<vmem>>, vector<2x1xf32>,
    return
  }
  func.func @transform_0(%arg0: i32) -> (i32, i32) {
    %c0_i32 = arith.constant 0 : i32
    %c0_i32_0 = arith.constant 0 : i32
    %c0_i32_1 = arith.constant 0 : i32
    return %c0_i32, %c0_i32_0 : i32, i32
  }
  func.func @transform_1(%arg0: i32) -> (i32, i32) {
    %c0_i32 = arith.constant 0 : i32
    %c0_i32_0 = arith.constant 0 : i32
    %c0_i32_1 = arith.constant 0 : i32
    return %c0_i32, %c0_i32_0 : i32, i32
  }
  func.func @transform_2(%arg0: i32) -> (i32, i32) {
    %c0_i32 = arith.constant 0 : i32
    %c0_i32_0 = arith.constant 0 : i32
    %c0_i32_1 = arith.constant 0 : i32
    return %c0_i32, %c0_i32_0 : i32, i32
  }
  func.func @transform_3(%arg0: i32) -> (i32, i32) {
    %c0_i32 = arith.constant 0 : i32
    %c0_i32_0 = arith.constant 0 : i32
    %c0_i32_1 = arith.constant 0 : i32
    return %c0_i32, %c0_i32_0 : i32, i32
  }
  func.func @transform_4(%arg0: i32) -> (i32, i32) {
    %c0_i32 = arith.constant 0 : i32
    %c0_i32_0 = arith.constant 0 : i32
    %c0_i32_1 = arith.constant 0 : i32
    return %c0_i32, %c0_i32_0 : i32, i32
  }
}

</mosaic_0001>

<bundles_post_ra>
// kernel: net_paper_forward.1
= control target key start
LH: loop header
LB: loop body
LE: loop exit
PB: predicated region body
PF: predicated region fallthrough
CT: control target
= control target key end

     0   :  { %9 = vsyncpa [#allocation3], 0  ;;  %s4739_s0 = inlined_call_operand.vmem [shape: bf16[64,128], index: 0, kind: input, shape index: {}]   ;;  %s4740_s1 = inlined_call_operand.hbm [shape: bf16[2304,128], index: 1, kind: input, shape index: {}]   ;;  %s4741_s2 = inlined_call_operand.hbm [shape: bf16[768,256], index: 2, kind: input, shape index: {}]   ;;  %s4742_s3 = inlined_call_operand.hbm [shape: f32[176,256], index: 3, kind: input, shape index: {}]   ;;  %s4743_s4 = inlined_call_operand.vmem [shape: f32[2,1], index: 4, kind: output, shape index: {}]  }
   0x1   :  { %10 = vsyncpa [#allocation5], 0  ;;  %s30_s17 = sshll.u32 %s4741_s2, 4  ;;  %s4348_s18 = smov [#allocation4]   ;;  %s31_s17 = int_to_ptr.hbm [resolvable:$true] %s30_s17 }
   0x2   :  { %s32_s19 = sshll.u32 %s4348_s18, 4  ;;  %s17_s22 = sshll.u32 %s4740_s1, 4  ;;  %s33_s19 = int_to_ptr.vmem [resolvable:$true] %s32_s19  ;;  %s18_s22 = int_to_ptr.hbm [resolvable:$true] %s17_s22 }
   0x3   :  { %s4349_s23 = smov 128   ;;  %s4350_s24 = smov 8  }
   0x4   :  { %38 = dma.hbm_to_vmem [thread:$0]  %s31_s17, 12288, %s33_s19, [#allocation5], %s4349_s23, %s4349_s23, %s4350_s24  }
   0x5   :  { %s4351_s25 = smov [#allocation2]   ;;  %s4352_s27 = smov 64  }
   0x6   :  { %s19_s26 = sshll.u32 %s4351_s25, 4  ;;  %s4353_s28 = smov 4   ;;  %s20_s26 = int_to_ptr.vmem [resolvable:$true] %s19_s26 }
   0x7   :  { %25 = dma.hbm_to_vmem [thread:$0]  %s18_s22, 18432, %s20_s26, [#allocation3], %s4352_s27, %s4352_s27, %s4353_s28  }
   0x8   :  { %s43_s30 = sshll.u32 %s4742_s3, 4  ;;  %s4354_s5 = smov [#allocation6]   ;;  %s44_s30 = int_to_ptr.hbm [resolvable:$true] %s43_s30 }
   0x9   :  { %s45_s6 = sshll.u32 %s4354_s5, 4  ;;  %s4355_s7 = smov 256   ;;  %s46_s6 = int_to_ptr.vmem [resolvable:$true] %s45_s6 }
   0xa   :  { %s4356_s1 = smov 16  }
   0xb   :  { %51 = dma.hbm_to_vmem [thread:$0]  %s44_s30, 5632, %s46_s6, [#allocation5], %s4355_s7, %s4355_s7, %s4356_s1  }
   0xc   :  { %4344 = dma.done.wait [#allocation3], 18432  }
   0xd   :  { %4345 = vsyncadd [#allocation3], 4294948864 }
   0xe   :  { %4346 = dma.done.wait [#allocation5], 17920  }
   0xf   :  { %4347 = vsyncadd [#allocation5], 4294949376  ;;  %v75_v0 = vlaneseq  ;;  %vm4357_vm0 = vmmov 1   ;;  %v4358_v3 = vmov 0   ;;  %v4027_v5 = vld [vmem:[#allocation2 + $0x38] sm:$0xff]  ;;  %v4026_v8 = vld [vmem:[#allocation2 + $0x30] sm:$0xff] }
  0x10   :  { %vm4396_vm1 = vmpackc.low %vm4357_vm0, %vm4357_vm0  ;;  %v4035_v6 = vld [vmem:[#allocation2 + $0x78] sm:$0xff]  ;;  %408 = vmatpush.bf16.msra.mxu0 %v4027_v5  ;;  %v4034_v9 = vld [vmem:[#allocation2 + $0x70] sm:$0xff]  ;;  %v4421_v24 = vunpack.c.l.b16 %v4358_v3  ;;  %v4429_v30 = vunpack.c.h.b16 %v4358_v3  ;;  %vm4744_vm4 = vcmask 1041408   ;;  %vm4746_vm5 = vcmask 1040384  }
  0x11   :  { %v4401_v2 = vshrl.u32 %v75_v0, 7  ;;  %v137_v4 = vsel %vm4396_vm1, 65537, %v4358_v3  ;;  %v4043_v7 = vld [vmem:[#allocation2 + $0xb8] sm:$0xff]  ;;  %437 = vmatpush.bf16.msra.mxu1 %v4035_v6  ;;  %v4042_v11 = vld [vmem:[#allocation2 + $0xb0] sm:$0xff]  ;;  %v4025_v13 = vld [vmem:[#allocation2 + $0x28] sm:$0xff]  ;;  %vm4745_vm14 = vcmask 1045504  }
  0x12   :  { %v4406_v10 = vunpack.c.l.b16 %v137_v4  ;;  %466 = vmatpush.bf16.msra.mxu2 %v4043_v7  ;;  %v4033_v14 = vld [vmem:[#allocation2 + $0x68] sm:$0xff]  ;;  %v4024_v17 = vld [vmem:[#allocation2 + $0x20] sm:$0xff]  ;;  %v4418_v23 = vld [vmem:[%s4739_s0] sm:$0xff] }
  0x13   :  { %v4409_v12 = vadd.s32 24, %v4401_v2  ;;  %v4041_v16 = vld [vmem:[#allocation2 + $0xa8] sm:$0xff]  ;;  %v4032_v18 = vld [vmem:[#allocation2 + $0x60] sm:$0xff]  ;;  %v4023_v26 = vld [vmem:[#allocation2 + $0x18] sm:$0xff]  ;;  %v109_v34 = vrot.slane %v4418_v23, 7  ;;  %vm80_vm12 = vcmp.ge.s32.totalorder %v4401_v2, 2 }
  0x14   :  { %409 = vmatpush.bf16.msra.mxu0 %v4026_v8  ;;  %v145_v15 = vpack.c.b16 %v4406_v10, %v4406_v10  ;;  %v4040_v20 = vld [vmem:[#allocation2 + $0xa0] sm:$0xff]  ;;  %v4031_v27 = vld [vmem:[#allocation2 + $0x58] sm:$0xff]  ;;  %v4022_v36 = vld [vmem:[#allocation2 + $0x10] sm:$0xff] }
  0x15   :  { %438 = vmatpush.bf16.msra.mxu1 %v4034_v9  ;;  %vm87_vm2 = vcmp.lt.s32.totalorder %v4409_v12, 30  ;;  %v4426_v25 = vld [vmem:[%s4739_s0 + $0x8] sm:$0xff]  ;;  %v4039_v32 = vld [vmem:[#allocation2 + $0x98] sm:$0xff]  ;;  %v4030_v37 = vld [vmem:[#allocation2 + $0x50] sm:$0xff]  ;;  %v122_v44 = vsel %vm4746_vm5, 0, %v109_v34 }
  0x16   :  { %467 = vmatpush.bf16.msra.mxu2 %v4042_v11  ;;  %v148_v19 = vrot.slane %v145_v15, 6  ;;  %vm136_vm3 = vmpackc.low %vm87_vm2, %vm87_vm2  ;;  %v110_v35 = vrot.slane %v4426_v25, 7  ;;  %v4038_v41 = vld [vmem:[#allocation2 + $0x90] sm:$0xff]  ;;  %v4021_v46 = vld [vmem:[#allocation2 + $0x8] sm:$0xff] }
  0x17   :  { %v140_v21 = vsel %vm136_vm3, 65537, %v4358_v3  ;;  %v4029_v47 = vld [vmem:[#allocation2 + $0x48] sm:$0xff]  ;;  %v4020_v52 = vld [vmem:[#allocation2] sm:$0xff]  ;;  %vm4469_vm13 = vmpackc.low %vm4357_vm0, %vm80_vm12 }
  0x18   :  { %410 = vmatpush.bf16.msra.mxu0 %v4025_v13  ;;  %v144_v22 = vunpack.c.l.b16 %v140_v21  ;;  %v152_v28 = vunpack.c.l.b16 %v148_v19  ;;  %v153_v29 = vunpack.c.h.b16 %v148_v19  ;;  %v111_v45 = vsel %vm4746_vm5, %v109_v34, %v110_v35  ;;  %v4037_v49 = vld [vmem:[#allocation2 + $0x88] sm:$0xff]  ;;  %v4028_v53 = vld [vmem:[#allocation2 + $0x40] sm:$0xff]  ;;  %v4019_v11 = vld [vmem:[%s4739_s0 + $0x18] sm:$0xff] }
  0x19   :  { %439 = vmatpush.bf16.msra.mxu1 %v4033_v14  ;;  %v4036_v54 = vld [vmem:[#allocation2 + $0x80] sm:$0xff]  ;;  %v4018_v59 = vld [vmem:[%s4739_s0 + $0x10] sm:$0xff]  ;;  %v129_v60 = vsel %vm4469_vm13, %v122_v44, 0  ;;  %v130_v13 = vsel %vm4396_vm1, %v111_v45, 0  ;;  %v114_v15 = vrot.slane %v4019_v11, 7 }
  0x1a   :  { %468 = vmatpush.bf16.msra.mxu2 %v4041_v16  ;;  %v146_v31 = vpack.c.b16 %v144_v22, %v4406_v10  ;;  %vm4437_vm6 = vcmp.ne.s32.totalorder %v152_v28, %v4421_v24  ;;  %vm4442_vm7 = vcmp.ne.s32.totalorder %v153_v29, %v4429_v30  ;;  %v112_v4 = vrot.slane %v4018_v59, 7  ;;  %v4059_v16 = vld [vmem:[#allocation2 + $0x138] sm:$0xff] }
  0x1b   :  { %vm158_vm8 = vmpackc.low %vm4442_vm7, %vm4437_vm6  ;;  %v125_v29 = vsel %vm4746_vm5, %v114_v15, 0 }
  0x1c   :  { %411 = vmatpush.bf16.msra.mxu0 %v4024_v17  ;;  %v4432_v33 = vrot.slane %v146_v31, 6  ;;  %v180_v50 = vsel %vm158_vm8, %v122_v44, 0  ;;  %v113_v7 = vsel %vm4746_vm5, %v110_v35, %v112_v4  ;;  %v4051_v17 = vld [vmem:[#allocation2 + $0xf8] sm:$0xff]  ;;  %v4050_v35 = vld [vmem:[#allocation2 + $0xf0] sm:$0xff] }
  0x1d   :  { %440 = vmatpush.bf16.msra.mxu1 %v4032_v18  ;;  %v195_v56 = vrot.slane %v180_v50, 2  ;;  %770 = vmatpush.bf16.msra.mxu3 %v4051_v17  ;;  %v4058_v18 = vld [vmem:[#allocation2 + $0x130] sm:$0xff]  ;;  %v131_v22 = vsel %vm4469_vm13, %v113_v7, 0  ;;  %v4045_v50 = vld [vmem:[#allocation2 + $0xc8] sm:$0xff] }
  0x1e   :  { %469 = vmatpush.bf16.msra.mxu2 %v4040_v20  ;;  %v150_v40 = vsel %vm4744_vm4, %v148_v19, %v4432_v33  ;;  %v151_v58 = vsel %vm4744_vm4, %v4432_v33, %v148_v19  ;;  %v115_v19 = vsel %vm4746_vm5, %v112_v4, %v114_v15  ;;  %v4054_v44 = vld [vmem:[#allocation2 + $0x110] sm:$0xff]  ;;  %v257_v4 = vld [vmem:[#allocation6 + $0x20] sm:$0xff] }
  0x1f   :  { %v159_v42 = vunpack.c.l.b16 %v150_v40  ;;  %v160_v43 = vunpack.c.h.b16 %v150_v40  ;;  %v166_v61 = vunpack.c.l.b16 %v151_v58  ;;  %v167_v62 = vunpack.c.h.b16 %v151_v58  ;;  %v4056_v40 = vld [vmem:[#allocation2 + $0x120] sm:$0xff] }
  0x20   :  { %412 = vmatpush.bf16.msra.mxu0 %v4023_v26 }
  0x21   :  { %441 = vmatpush.bf16.msra.mxu1 %v4031_v27  ;;  %vm163_vm9 = vcmp.ne.s32.totalorder %v159_v42, %v4421_v24  ;;  %vm164_vm10 = vcmp.ne.s32.totalorder %v160_v43, %v4429_v30  ;;  %vm4483_vm15 = vcmp.ne.s32.totalorder %v166_v61, %v4421_v24  ;;  %vm4488_vm2 = vcmp.ne.s32.totalorder %v167_v62, %v4429_v30  ;;  %v4055_v42 = vld [vmem:[#allocation2 + $0x118] sm:$0xff]  ;;  %v4062_v61 = vld [vmem:[#allocation2 + $0x150] sm:$0xff] }
  0x22   :  { %470 = vmatpush.bf16.msra.mxu2 %v4039_v32  ;;  %vm4456_vm11 = vmpackc.low %vm164_vm10, %vm163_vm9  ;;  %771 = vmatpush.bf16.msra.mxu3 %v4050_v35  ;;  %v4047_v43 = vld [vmem:[#allocation2 + $0xd8] sm:$0xff] }
  0x23   :  { %v181_v51 = vsel %vm4456_vm11, %v111_v45, 0  ;;  %vm172_vm3 = vmpackc.low %vm4488_vm2, %vm4483_vm15  ;;  %v183_v20 = vsel %vm4456_vm11, %v115_v19, 0  ;;  %v4067_v45 = vld [vmem:[#allocation2 + $0x178] sm:$0xff] }
  0x24   :  { %413 = vmatpush.bf16.msra.mxu0 %v4022_v36  ;;  %v196_v57 = vrot.slane %v181_v51, 2  ;;  %v182_v8 = vsel %vm172_vm3, %v113_v7, 0  ;;  %v200_v21 = vrot.slane %v183_v20, 2  ;;  %v4057_v36 = vld [vmem:[#allocation2 + $0x128] sm:$0xff]  ;;  %v4052_v51 = vld [vmem:[#allocation2 + $0x100] sm:$0xff] }
  0x25   :  { %442 = vmatpush.bf16.msra.mxu1 %v4030_v37  ;;  %v198_v9 = vrot.slane %v182_v8, 2  ;;  %v4049_v37 = vld [vmem:[#allocation2 + $0xe8] sm:$0xff] }
  0x26   :  { %471 = vmatpush.bf16.msra.mxu2 %v4038_v41  ;;  %v197_v63 = vsel %vm4745_vm14, %v195_v56, %v196_v57  ;;  %772 = vmatpush.bf16.msra.mxu3 %v4049_v37  ;;  %v4048_v41 = vld [vmem:[#allocation2 + $0xe0] sm:$0xff]  ;;  %v256_v56 = vld [vmem:[#allocation6 + $0x10] sm:$0xff] }
  0x27   :  { %v199_v14 = vsel %vm4745_vm14, %v196_v57, %v198_v9  ;;  %v201_v26 = vsel %vm4745_vm14, %v198_v9, %v200_v21  ;;  %v4061_v9 = vld [vmem:[#allocation2 + $0x148] sm:$0xff] }
  0x28   :  { %414 = vmatpush.bf16.msra.mxu0 %v4021_v46  ;;  %v4046_v46 = vld [vmem:[#allocation2 + $0xd0] sm:$0xff] }
  0x29   :  { %443 = vmatpush.bf16.msra.mxu1 %v4029_v47  ;;  %v4053_v47 = vld [vmem:[#allocation2 + $0x108] sm:$0xff] }
  0x2a   :  { %472 = vmatpush.bf16.msra.mxu2 %v4037_v49  ;;  %773 = vmatpush.bf16.msra.mxu3 %v4048_v41  ;;  %v4066_v49 = vld [vmem:[#allocation2 + $0x170] sm:$0xff] }
  0x2c   :  { %415 = vmatpush.bf16.msra.mxu0 %v4020_v52  ;;  %v4065_v52 = vld [vmem:[#allocation2 + $0x168] sm:$0xff] }
  0x2d   :  { %444 = vmatpush.bf16.msra.mxu1 %v4028_v53  ;;  %v4044_v53 = vld [vmem:[#allocation2 + $0xc0] sm:$0xff] }
  0x2e   :  { %473 = vmatpush.bf16.msra.mxu2 %v4036_v54  ;;  %774 = vmatpush.bf16.msra.mxu3 %v4047_v43  ;;  %v4064_v54 = vld [vmem:[#allocation2 + $0x160] sm:$0xff] }
  0x2f   :  { %416 = vmatmul.bf16.vlgmr.msra.gmra.mxu0 %v129_v60 }
  0x30   :  { %445 = vmatmul.bf16.vlgmr.msra.gmra.mxu1 %v4418_v23  ;;  %799 = vmatpush.bf16.msrb.mxu0 %v4059_v16  ;;  %v173_v23 = vunpack.c.l.b16 %v4432_v33 }
  0x31   :  { %474 = vmatmul.bf16.vlgmr.msra.gmra.mxu2 %v197_v63  ;;  %828 = vmatpush.bf16.msrb.mxu1 %v4067_v45 }
  0x32   :  { %vm4518_vm9 = vcmp.ne.s32.totalorder %v173_v23, %v4421_v24  ;;  %775 = vmatpush.bf16.msra.mxu3 %v4046_v46 }
  0x34   :  { %800 = vmatpush.bf16.msrb.mxu0 %v4058_v18  ;;  %v258_v18 = vld [vmem:[#allocation6 + $0x30] sm:$0xff] }
  0x35   :  { %829 = vmatpush.bf16.msrb.mxu1 %v4066_v49  ;;  %v260_v49 = vld [vmem:[#allocation6 + $0x50] sm:$0xff] }
  0x36   :  { %776 = vmatpush.bf16.msra.mxu3 %v4045_v50 }
  0x38   :  { %801 = vmatpush.bf16.msrb.mxu0 %v4057_v36 }
  0x39   :  { %830 = vmatpush.bf16.msrb.mxu1 %v4065_v52 }
  0x3a   :  { %777 = vmatpush.bf16.msra.mxu3 %v4044_v53 }
  0x3c   :  { %802 = vmatpush.bf16.msrb.mxu0 %v4056_v40 }
  0x3d   :  { %831 = vmatpush.bf16.msrb.mxu1 %v4064_v54 }
  0x3f   :  { %421 = vmatmul.bf16.gmra.mxu0 %v130_v13 }
  0x40   :  { %450 = vmatmul.bf16.gmra.mxu1 %v4426_v25  ;;  %v174_v25 = vunpack.c.h.b16 %v4432_v33  ;;  %v132_v33 = vsel %vm4396_vm1, %v115_v19, 0  ;;  %803 = vmatpush.bf16.msrb.mxu0 %v4055_v42 }
  0x41   :  { %479 = vmatmul.bf16.gmra.mxu2 %v199_v14  ;;  %v4060_v14 = vld [vmem:[#allocation2 + $0x140] sm:$0xff] }
  0x42   :  { %vm4523_vm10 = vcmp.ne.s32.totalorder %v174_v25, %v4429_v30 }
  0x43   :  { %vm179_vm12 = vmpackc.low %vm4523_vm10, %vm4518_vm9 }
  0x44   :  { %v184_v31 = vsel %vm179_vm12, %v125_v29, 0  ;;  %804 = vmatpush.bf16.msrb.mxu0 %v4054_v44 }
  0x45   :  { %v202_v32 = vrot.slane %v184_v31, 2 }
  0x47   :  { %v203_v34 = vsel %vm4745_vm14, %v200_v21, %v202_v32 }
  0x48   :  { %805 = vmatpush.bf16.msrb.mxu0 %v4053_v47 }
  0x4c   :  { %806 = vmatpush.bf16.msrb.mxu0 %v4052_v51 }
  0x4f   :  { %426 = vmatmul.bf16.gmra.mxu0 %v131_v22 }
  0x50   :  { %455 = vmatmul.bf16.gmra.mxu1 %v4018_v59  ;;  %v4063_v59 = vld [vmem:[#allocation2 + $0x158] sm:$0xff] }
  0x51   :  { %484 = vmatmul.bf16.gmra.mxu2 %v201_v26  ;;  %832 = vmatpush.bf16.msrb.mxu1 %v4063_v59 }
  0x55   :  { %833 = vmatpush.bf16.msrb.mxu1 %v4062_v61 }
  0x59   :  { %834 = vmatpush.bf16.msrb.mxu1 %v4061_v9 }
  0x5d   :  { %835 = vmatpush.bf16.msrb.mxu1 %v4060_v14 }
  0x5f   :  { %431 = vmatmul.bf16.gmra.mxu0 %v132_v33 }
  0x60   :  { %460 = vmatmul.bf16.gmra.mxu1 %v4019_v11 }
  0x61   :  { %489 = vmatmul.bf16.gmra.mxu2 %v203_v34  ;;  %v259_v34 = vld [vmem:[#allocation6 + $0x40] sm:$0xff] }
  0xac   :  { %v417_v57 = vpop.f32.mrf.mxu0 }
  0xad   :  { %v446_v58 = vpop.f32.mrf.mxu1  ;;  %v418_v60 = vadd.f32 %v417_v57, %v256_v56 }
  0xaf   :  { %v447_v62 = vadd.f32 %v446_v58, %v418_v60 }
  0xb4   :  { %v475_v63 = vpop.f32.mrf.mxu2  ;;  %v419_v7 = vpop.f32.mrf.mxu0 }
  0xb5   :  { %v448_v8 = vpop.f32.mrf.mxu1  ;;  %v476_v11 = vadd.f32 %v475_v63, %v447_v62  ;;  %v420_v13 = vadd.f32 %v419_v7, %v257_v4  ;;  %v261_v62 = vld [vmem:[#allocation6 + $0x60] sm:$0xff] }
  0xb7   :  { %v495_v15 = vmax.f32 %v476_v11, 0.0  ;;  %v449_v16 = vadd.f32 %v448_v8, %v420_v13 }
  0xb9   :  { %v503_v22 = vpack.c.bf16 %v495_v15, %v495_v15 }
  0xbb   :  { %v519_v29 = vunpack.c.l.b16 %v503_v22  ;;  %v262_v22 = vld [vmem:[#allocation6 + $0x70] sm:$0xff] }
  0xbc   :  { %v477_v17 = vpop.f32.mrf.mxu2  ;;  %v422_v20 = vpop.f32.mrf.mxu0 }
  0xbd   :  { %v478_v19 = vadd.f32 %v477_v17, %v449_v16  ;;  %v451_v21 = vpop.f32.mrf.mxu1  ;;  %v423_v25 = vadd.f32 %v422_v20, %v258_v18 }
  0xbf   :  { %v496_v23 = vmax.f32 %v478_v19, 0.0  ;;  %v452_v32 = vadd.f32 %v451_v21, %v423_v25 }
  0xc1   :  { %v504_v26 = vpack.c.bf16 %v496_v23, %v496_v23 }
  0xc3   :  { %v520_v31 = vunpack.c.l.b16 %v504_v26 }
  0xc4   :  { %v480_v33 = vpop.f32.mrf.mxu2  ;;  %v424_v35 = vpop.f32.mrf.mxu0 }
  0xc5   :  { %v453_v36 = vpop.f32.mrf.mxu1  ;;  %v527_v37 = vpack.c.b16 %v520_v31, %v519_v29  ;;  %v481_v40 = vadd.f32 %v480_v33, %v452_v32  ;;  %v425_v41 = vadd.f32 %v424_v35, %v259_v34 }
  0xc7   :  { %807 = vmatmul.bf16.vlgmr.msrb.gmra.mxu0 %v527_v37  ;;  %v531_v42 = vrot.slane %v527_v37, 7  ;;  %v497_v45 = vmax.f32 %v481_v40, 0.0  ;;  %v454_v46 = vadd.f32 %v453_v36, %v425_v41  ;;  %v263_v37 = vld [vmem:[#allocation6 + $0x80] sm:$0xff] }
  0xc9   :  { %v542_v43 = vsel %vm4746_vm5, 0, %v531_v42  ;;  %v505_v53 = vpack.c.bf16 %v497_v45, %v497_v45 }
  0xca   :  { %v547_v44 = vsel %vm4469_vm13, %v542_v43, 0  ;;  %v551_v13 = vsel %vm158_vm8, %v542_v43, 0  ;;  %vm879_vm8 = vcmp.eq.s32.totalorder %v4401_v2, 0 }
  0xcb   :  { %778 = vmatmul.bf16.vlgmr.msra.gmra.mxu3 %v547_v44  ;;  %v521_v58 = vunpack.c.l.b16 %v505_v53  ;;  %v565_v17 = vrot.slane %v551_v13, 2 }
  0xcc   :  { %v482_v47 = vpop.f32.mrf.mxu2  ;;  %v427_v51 = vpop.f32.mrf.mxu0 }
  0xcd   :  { %v483_v50 = vadd.f32 %v482_v47, %v454_v46  ;;  %v456_v52 = vpop.f32.mrf.mxu1  ;;  %v428_v56 = vadd.f32 %v427_v51, %v260_v49 }
  0xcf   :  { %v498_v54 = vmax.f32 %v483_v50, 0.0  ;;  %v457_v60 = vadd.f32 %v456_v52, %v428_v56 }
  0xd1   :  { %v506_v57 = vpack.c.bf16 %v498_v54, %v498_v54 }
  0xd3   :  { %v522_v59 = vunpack.c.l.b16 %v506_v57 }
  0xd4   :  { %v485_v61 = vpop.f32.mrf.mxu2  ;;  %v429_v63 = vpop.f32.mrf.mxu0 }
  0xd5   :  { %v528_v4 = vpack.c.b16 %v522_v59, %v521_v58  ;;  %v458_v7 = vpop.f32.mrf.mxu1  ;;  %v486_v8 = vadd.f32 %v485_v61, %v457_v60  ;;  %v430_v9 = vadd.f32 %v429_v63, %v261_v62 }
  0xd7   :  { %v532_v11 = vrot.slane %v528_v4, 7  ;;  %812 = vmatmul.bf16.gmra.mxu0 %v528_v4  ;;  %v499_v18 = vmax.f32 %v486_v8, 0.0  ;;  %v459_v19 = vadd.f32 %v458_v7, %v430_v9 }
  0xd9   :  { %v533_v14 = vsel %vm4746_vm5, %v531_v42, %v532_v11  ;;  %v507_v25 = vpack.c.bf16 %v499_v18, %v499_v18 }
  0xda   :  { %v548_v15 = vsel %vm4396_vm1, %v533_v14, 0  ;;  %v552_v16 = vsel %vm4456_vm11, %v533_v14, 0 }
  0xdb   :  { %v566_v20 = vrot.slane %v552_v16, 2  ;;  %783 = vmatmul.bf16.gmra.mxu3 %v548_v15  ;;  %v523_v33 = vunpack.c.l.b16 %v507_v25 }
  0xdc   :  { %v487_v21 = vpop.f32.mrf.mxu2  ;;  %v432_v23 = vpop.f32.mrf.mxu0 }
  0xdd   :  { %v488_v39 = vadd.f32 %v487_v21, %v459_v19  ;;  %v567_v38 = vsel %vm4745_vm14, %v565_v17, %v566_v20  ;;  %v433_v29 = vadd.f32 %v432_v23, %v262_v22  ;;  %v461_v31 = vpop.f32.mrf.mxu1 }
  0xde   :  { %836 = vmatmul.bf16.vlgmr.msrb.gmra.mxu1 %v567_v38 }
  0xdf   :  { %v500_v26 = vmax.f32 %v488_v39, 0.0  ;;  %v462_v35 = vadd.f32 %v461_v31, %v433_v29  ;;  %v4579_v31 = vand.u32 127, %v75_v0 }
  0xe1   :  { %v508_v32 = vpack.c.bf16 %v500_v26, %v500_v26 }
  0xe3   :  { %v524_v34 = vunpack.c.l.b16 %v508_v32  ;;  %v859_v32 = vmul.u32 2, %v4401_v2 }
  0xe4   :  { %v490_v36 = vpop.f32.mrf.mxu2  ;;  %v434_v40 = vpop.f32.mrf.mxu0 }
  0xe5   :  { %v529_v41 = vpack.c.b16 %v524_v34, %v523_v33  ;;  %v491_v42 = vadd.f32 %v490_v36, %v462_v35  ;;  %v435_v43 = vadd.f32 %v434_v40, %v263_v37  ;;  %v463_v46 = vpop.f32.mrf.mxu1  ;;  %v863_v34 = vsub.s32 %v4579_v31, %v859_v32  ;;  %v4090_v32 = vld [vmem:[#allocation2 + $0x230] sm:$0xff] }
  0xe6   :  { %v3658_v40 = vld [vmem:[#allocation4 + $0xb0] sm:$0xf] }
  0xe7   :  { %v534_v44 = vrot.slane %v529_v41, 7  ;;  %817 = vmatmul.bf16.gmra.mxu0 %v529_v41  ;;  %v501_v50 = vmax.f32 %v491_v42, 0.0  ;;  %v464_v51 = vadd.f32 %v463_v46, %v435_v43  ;;  %vm871_vm6 = vcmp.le.s32.totalorder %v863_v34, 1 }
  0xe8   :  { %vm891_vm15 = vcmp.eq.s32.totalorder %v863_v34, 4294967295 }
  0xe9   :  { %v535_v45 = vsel %vm4746_vm5, %v532_v11, %v534_v44  ;;  %v509_v57 = vpack.c.bf16 %v501_v50, %v501_v50 }
  0xea   :  { %v549_v47 = vsel %vm4469_vm13, %v535_v45, 0  ;;  %v553_v49 = vsel %vm172_vm3, %v535_v45, 0 }
  0xeb   :  { %v568_v52 = vrot.slane %v553_v49, 2  ;;  %788 = vmatmul.bf16.gmra.mxu3 %v549_v47  ;;  %v525_v60 = vunpack.c.l.b16 %v509_v57  ;;  %v78_v57 = vadd.s32 16, %v4401_v2 }
  0xec   :  { %v492_v53 = vpop.f32.mrf.mxu2 }
  0xed   :  { %v493_v54 = vadd.f32 %v492_v53, %v464_v51  ;;  %v569_v56 = vsel %vm4745_vm14, %v566_v20, %v568_v52  ;;  %v4602_v53 = vadd.s32 8, %v4401_v2 }
  0xee   :  { %841 = vmatmul.bf16.gmra.mxu1 %v569_v56 }
  0xef   :  { %v502_v58 = vmax.f32 %v493_v54, 0.0 }
  0xf1   :  { %v510_v59 = vpack.c.bf16 %v502_v58, %v502_v58 }
  0xf3   :  { %v526_v61 = vunpack.c.l.b16 %v510_v59 }
  0xf5   :  { %v530_v62 = vpack.c.b16 %v526_v61, %v525_v60  ;;  %v860_v61 = vmul.u32 2, %v4602_v53 }
  0xf7   :  { %v536_v6 = vrot.slane %v530_v62, 7  ;;  %822 = vmatmul.bf16.gmra.mxu0 %v530_v62  ;;  %v4075_v62 = vld [vmem:[#allocation2 + $0x1b8] sm:$0xff] }
  0xf8   :  { %1223 = vmatpush.bf16.msrb.mxu3 %v4075_v62 }
  0xf9   :  { %v537_v5 = vsel %vm4746_vm5, %v534_v44, %v536_v6  ;;  %v545_v9 = vsel %vm4746_vm5, %v536_v6, 0 }
  0xfa   :  { %v550_v63 = vsel %vm4396_vm1, %v537_v5, 0  ;;  %v554_v4 = vsel %vm4456_vm11, %v537_v5, 0  ;;  %v555_v11 = vsel %vm179_vm12, %v545_v9, 0  ;;  %vm867_vm1 = vcmp.ge.s32.totalorder %v863_v34, 4294967295  ;;  %vm895_vm12 = vmand %vm879_vm8, %vm891_vm15  ;;  %v911_v34 = vld [vmem:[#allocation6 + $0x90] sm:$0xff] }
  0xfb   :  { %v570_v7 = vrot.slane %v554_v4, 2  ;;  %793 = vmatmul.bf16.gmra.mxu3 %v550_v63  ;;  %v572_v13 = vrot.slane %v555_v11, 2  ;;  %vm4583_vm7 = vmand %vm867_vm1, %vm871_vm6  ;;  %vm2154_vm11 = vcmp.eq.s32.totalorder %v4401_v2, 4  ;;  %v861_v63 = vmul.u32 2, %v78_v57  ;;  %v4074_v4 = vld [vmem:[#allocation2 + $0x1b0] sm:$0xff] }
  0xfc   :  { %vm2155_vm2 = vmor %vm879_vm8, %vm2154_vm11  ;;  %v4359_v9 = vmov 0.0   ;;  %vm915_vm8 = vcmask 523264   ;;  %1224 = vmatpush.bf16.msrb.mxu3 %v4074_v4 }
  0xfd   :  { %v571_v8 = vsel %vm4745_vm14, %v568_v52, %v570_v7  ;;  %v573_v1 = vsel %vm4745_vm14, %v570_v7, %v572_v13  ;;  %vm2156_vm3 = vmand %vm2155_vm2, %vm891_vm15  ;;  %v865_v13 = vsub.s32 %v4579_v31, %v861_v63  ;;  %vm885_vm2 = vcmp.eq.s32.totalorder %v78_v57, 16 }
  0xfe   :  { %846 = vmatmul.bf16.gmra.mxu1 %v571_v8  ;;  %vm4593_vm9 = vmxor %vm2156_vm3, %vm4357_vm0  ;;  %v4619_v8 = vsub.s32 %v4579_v31, %v860_v61 }
  0xff   :  { %vm4609_vm1 = vmxor %vm895_vm12, %vm4357_vm0  ;;  %vm893_vm3 = vcmp.eq.s32.totalorder %v865_v13, 4294967295 }
 0x100   :  { %vm903_vm6 = vmand %vm4583_vm7, %vm4609_vm1  ;;  %vm868_vm11 = vcmp.ge.s32.totalorder %v4619_v8, 4294967295  ;;  %vm872_vm15 = vcmp.le.s32.totalorder %v4619_v8, 1  ;;  %vm869_vm1 = vcmp.ge.s32.totalorder %v865_v13, 4294967295 }
 0x101   :  { %v4622_v11 = vsel %vm903_vm6, 0.33333334, %v4359_v9  ;;  %vm4630_vm12 = vmand %vm868_vm11, %vm872_vm15  ;;  %vm873_vm6 = vcmp.le.s32.totalorder %v865_v13, 1 }
 0x102   :  { %vm897_vm10 = vmand %vm885_vm2, %vm893_vm3 }
 0x103   :  { %vm877_vm4 = vmand %vm869_vm1, %vm873_vm6  ;;  %vm4777_vm6 = vcmask 1045504  }
 0x104   :  { %vm901_vm14 = vmxor %vm897_vm10, %vm4357_vm0 }
 0x105   :  { %vm905_vm5 = vmand %vm877_vm4, %vm901_vm14  ;;  %vm966_vm4 = vcmp.lt.s32.totalorder %v4602_v53, 14  ;;  %vm4773_vm14 = vcmask 1040384  }
 0x106   :  { %vm4774_vm10 = vmmov %vm4773_vm14 }
 0x10e   :  { %851 = vmatmul.bf16.gmra.mxu1 %v573_v1  ;;  %v4083_v1 = vld [vmem:[#allocation2 + $0x1f8] sm:$0xff] }
 0x144   :  { %v808_v14 = vpop.f32.mrf.mxu0 }
 0x14c   :  { %v810_v16 = vpop.f32.mrf.mxu0 }
 0x14e   :  { %v779_v48 = vpop.f32.mrf.mxu3 }
 0x14f   :  { %v809_v15 = vadd.f32 %v808_v14, %v779_v48  ;;  %v4082_v14 = vld [vmem:[#allocation2 + $0x1f0] sm:$0xff]  ;;  %v4119_v48 = vld [vmem:[#allocation2 + $0x318] sm:$0xff] }
 0x154   :  { %v813_v21 = vpop.f32.mrf.mxu0 }
 0x156   :  { %v781_v17 = vpop.f32.mrf.mxu3 }
 0x157   :  { %v811_v6 = vadd.f32 %v810_v16, %v781_v17  ;;  %v862_v16 = vmul.u32 2, %v4409_v12  ;;  %v4080_v12 = vld [vmem:[#allocation2 + $0x1e0] sm:$0xff] }
 0x159   :  { %v866_v17 = vsub.s32 %v4579_v31, %v862_v16  ;;  %v4091_v31 = vld [vmem:[#allocation2 + $0x238] sm:$0xff] }
 0x15b   :  { %v837_v18 = vpop.f32.mrf.mxu1  ;;  %vm870_vm11 = vcmp.ge.s32.totalorder %v866_v17, 4294967295  ;;  %vm874_vm15 = vcmp.le.s32.totalorder %v866_v17, 1 }
 0x15c   :  { %v4576_v19 = vadd.f32 %v837_v18, %v809_v15  ;;  %v815_v39 = vpop.f32.mrf.mxu0  ;;  %v908_v15 = vsel %vm4630_vm12, 0.33333334, %v4359_v9  ;;  %v909_v18 = vsel %vm905_vm5, 0.33333334, %v4359_v9  ;;  %vm878_vm2 = vmand %vm870_vm11, %vm874_vm15 }
 0x15d   :  { %vm990_vm5 = vmpackc.low %vm966_vm4, %vm966_vm4 }
 0x15e   :  { %v784_v20 = vpop.f32.mrf.mxu3  ;;  %v992_v4 = vsel %vm990_vm5, 65537, %v4358_v3  ;;  %vm4778_vm11 = vmmov %vm4774_vm10 }
 0x15f   :  { %v814_v58 = vadd.f32 %v813_v21, %v784_v20  ;;  %v4081_v20 = vld [vmem:[#allocation2 + $0x1e8] sm:$0xff]  ;;  %vm4779_vm15 = vmmov %vm4777_vm6 }
 0x160   :  { %v4073_v21 = vld [vmem:[#allocation2 + $0x1a8] sm:$0xff]  ;;  %vm4782_vm5 = vmmov %vm4777_vm6 }
 0x161   :  { %1225 = vmatpush.bf16.msrb.mxu3 %v4073_v21 }
 0x163   :  { %v839_v22 = vpop.f32.mrf.mxu1 }
 0x164   :  { %v818_v38 = vpop.f32.mrf.mxu0  ;;  %v840_v7 = vadd.f32 %v839_v22, %v811_v6  ;;  %v4072_v22 = vld [vmem:[#allocation2 + $0x1a0] sm:$0xff] }
 0x165   :  { %1226 = vmatpush.bf16.msrb.mxu3 %v4072_v22 }
 0x166   :  { %v786_v28 = vpop.f32.mrf.mxu3 }
 0x167   :  { %v816_v54 = vadd.f32 %v815_v39, %v786_v28  ;;  %v4079_v28 = vld [vmem:[#allocation2 + $0x1d8] sm:$0xff] }
 0x168   :  { %v4071_v39 = vld [vmem:[#allocation2 + $0x198] sm:$0xff] }
 0x169   :  { %1227 = vmatpush.bf16.msrb.mxu3 %v4071_v39 }
 0x16b   :  { %v842_v27 = vpop.f32.mrf.mxu1 }
 0x16c   :  { %v820_v33 = vpop.f32.mrf.mxu0  ;;  %v843_v5 = vadd.f32 %v842_v27, %v814_v58  ;;  %v4078_v27 = vld [vmem:[#allocation2 + $0x1d0] sm:$0xff]  ;;  %v4084_v58 = vld [vmem:[#allocation2 + $0x200] sm:$0xff] }
 0x16e   :  { %v789_v23 = vpop.f32.mrf.mxu3 }
 0x16f   :  { %v819_v51 = vadd.f32 %v818_v38, %v789_v23  ;;  %v4070_v23 = vld [vmem:[#allocation2 + $0x190] sm:$0xff]  ;;  %v4077_v38 = vld [vmem:[#allocation2 + $0x1c8] sm:$0xff] }
 0x170   :  { %1228 = vmatpush.bf16.msrb.mxu3 %v4070_v23 }
 0x173   :  { %v844_v25 = vpop.f32.mrf.mxu1 }
 0x174   :  { %v823_v0 = vpop.f32.mrf.mxu0  ;;  %v845_v59 = vadd.f32 %v844_v25, %v816_v54  ;;  %v4069_v25 = vld [vmem:[#allocation2 + $0x188] sm:$0xff] }
 0x175   :  { %1229 = vmatpush.bf16.msrb.mxu3 %v4069_v25 }
 0x176   :  { %v791_v26 = vpop.f32.mrf.mxu3 }
 0x177   :  { %v821_v49 = vadd.f32 %v820_v33, %v791_v26  ;;  %v4076_v26 = vld [vmem:[#allocation2 + $0x1c0] sm:$0xff]  ;;  %v4089_v33 = vld [vmem:[#allocation2 + $0x228] sm:$0xff] }
 0x17b   :  { %v847_v29 = vpop.f32.mrf.mxu1 }
 0x17c   :  { %v825_v43 = vpop.f32.mrf.mxu0  ;;  %v848_v56 = vadd.f32 %v847_v29, %v819_v51  ;;  %v4068_v29 = vld [vmem:[#allocation2 + $0x180] sm:$0xff] }
 0x17d   :  { %1230 = vmatpush.bf16.msrb.mxu3 %v4068_v29 }
 0x17e   :  { %v794_v36 = vpop.f32.mrf.mxu3 }
 0x17f   :  { %v824_v46 = vadd.f32 %v823_v0, %v794_v36  ;;  %v4088_v36 = vld [vmem:[#allocation2 + $0x220] sm:$0xff] }
 0x181   :  { %1261 = vmatpush.bf16.msra.mxu3 %v4091_v31 }
 0x183   :  { %v849_v35 = vpop.f32.mrf.mxu1 }
 0x184   :  { %v850_v52 = vadd.f32 %v849_v35, %v821_v49 }
 0x185   :  { %1262 = vmatpush.bf16.msra.mxu3 %v4090_v32 }
 0x186   :  { %v796_v42 = vpop.f32.mrf.mxu3 }
 0x187   :  { %v826_v44 = vadd.f32 %v825_v43, %v796_v42  ;;  %v4087_v42 = vld [vmem:[#allocation2 + $0x218] sm:$0xff] }
 0x189   :  { %1263 = vmatpush.bf16.msra.mxu3 %v4089_v33 }
 0x18b   :  { %v852_v41 = vpop.f32.mrf.mxu1 }
 0x18c   :  { %v853_v50 = vadd.f32 %v852_v41, %v824_v46  ;;  %v912_v41 = vld [vmem:[#allocation6 + $0xa0] sm:$0xff] }
 0x18d   :  { %1264 = vmatpush.bf16.msra.mxu3 %v4088_v36  ;;  %v4099_v36 = vld [vmem:[#allocation2 + $0x278] sm:$0xff] }
 0x18e   :  { %1517 = vmatpush.bf16.msra.mxu0 %v4099_v36 }
 0x191   :  { %1265 = vmatpush.bf16.msra.mxu3 %v4087_v42  ;;  %v4105_v42 = vld [vmem:[#allocation2 + $0x2a8] sm:$0xff] }
 0x193   :  { %v854_v45 = vpop.f32.mrf.mxu1 }
 0x194   :  { %v855_v47 = vadd.f32 %v854_v45, %v826_v44  ;;  %v4086_v45 = vld [vmem:[#allocation2 + $0x210] sm:$0xff] }
 0x195   :  { %1266 = vmatpush.bf16.msra.mxu3 %v4086_v45 }
 0x196   :  { %936 = vmatpush.msrb.mxu2 %v855_v47 }
 0x198   :  { %937 = vmatpush.msrb.mxu2 %v853_v50  ;;  %v4085_v50 = vld [vmem:[#allocation2 + $0x208] sm:$0xff] }
 0x199   :  { %1267 = vmatpush.bf16.msra.mxu3 %v4085_v50  ;;  %v4102_v50 = vld [vmem:[#allocation2 + $0x290] sm:$0xff] }
 0x19a   :  { %938 = vmatpush.msrb.mxu2 %v850_v52 }
 0x19c   :  { %939 = vmatpush.msrb.mxu2 %v848_v56  ;;  %v913_v56 = vld [vmem:[#allocation6 + $0xb0] sm:$0xff] }
 0x19d   :  { %1268 = vmatpush.bf16.msra.mxu3 %v4084_v58  ;;  %v4093_v58 = vld [vmem:[#allocation2 + $0x248] sm:$0xff] }
 0x19e   :  { %940 = vmatpush.msrb.mxu2 %v845_v59 }
 0x1a0   :  { %941 = vmatpush.msrb.mxu2 %v843_v5  ;;  %v914_v5 = vld [vmem:[#allocation6 + $0xc0] sm:$0xff] }
 0x1a2   :  { %942 = vmatpush.msrb.mxu2 %v840_v7 }
 0x1a4   :  { %943 = vmatpush.msrb.mxu2 %v4576_v19  ;;  %v910_v19 = vsel %vm878_vm2, 0.33333334, %v4359_v9  ;;  %vm4780_vm2 = vmmov %vm4774_vm10 }
 0x1a5   :  { %3239 = vmatmul.msk.f32.vlgmr.msrb.gmra.mxu2 %vm915_vm8, %v4622_v11  ;;  %vm4781_vm4 = vmmov %vm4780_vm2 }
 0x1a6   :  { %1242 = vmatpush.bf16.msra.mxu2 %v4083_v1 }
 0x1aa   :  { %1243 = vmatpush.bf16.msra.mxu2 %v4082_v14  ;;  %v994_v14 = vunpack.c.l.b16 %v992_v4  ;;  %v4111_v4 = vld [vmem:[#allocation2 + $0x2d8] sm:$0xff] }
 0x1ad   :  { %3240 = vmatmul.msk.f32.gmra.mxu2 %vm915_vm8, %v908_v15 }
 0x1ae   :  { %1244 = vmatpush.bf16.msra.mxu2 %v4081_v20 }
 0x1b2   :  { %1245 = vmatpush.bf16.msra.mxu2 %v4080_v12 }
 0x1b5   :  { %3241 = vmatmul.msk.f32.gmra.mxu2 %vm915_vm8, %v909_v18  ;;  %v995_v18 = vpack.c.b16 %v994_v14, %v4406_v10  ;;  %v1076_v14 = vld [vmem:[#allocation6 + $0xe0] sm:$0xff] }
 0x1b6   :  { %1246 = vmatpush.bf16.msra.mxu2 %v4079_v28 }
 0x1b7   :  { %v996_v21 = vrot.slane %v995_v18, 6 }
 0x1b9   :  { %v998_v39 = vunpack.c.l.b16 %v996_v21 }
 0x1ba   :  { %1247 = vmatpush.bf16.msra.mxu2 %v4078_v27  ;;  %v999_v27 = vunpack.c.h.b16 %v996_v21  ;;  %v4108_v21 = vld [vmem:[#allocation2 + $0x2c0] sm:$0xff] }
 0x1bc   :  { %vm1003_vm3 = vcmp.ne.s32.totalorder %v999_v27, %v4429_v30  ;;  %v1077_v27 = vld [vmem:[#allocation6 + $0xf0] sm:$0xff] }
 0x1bd   :  { %3242 = vmatmul.msk.f32.gmra.mxu2 %vm915_vm8, %v910_v19  ;;  %vm1002_vm8 = vcmp.ne.s32.totalorder %v998_v39, %v4421_v24 }
 0x1be   :  { %1248 = vmatpush.bf16.msra.mxu2 %v4077_v38  ;;  %vm4656_vm1 = vmpackc.low %vm1003_vm3, %vm1002_vm8  ;;  %vm1575_vm8 = vcmp.eq.s32.totalorder %v4602_v53, 8  ;;  %v4122_v53 = vld [vmem:[#allocation2 + $0x330] sm:$0xff] }
 0x1c2   :  { %1249 = vmatpush.bf16.msra.mxu2 %v4076_v26 }
 0x228   :  { %v945_v35 = vpop.f32.mrf.mxu2 }
 0x229   :  { %v946_v0 = vadd.f32 %v945_v35, %v911_v34  ;;  %v4107_v35 = vld [vmem:[#allocation2 + $0x2b8] sm:$0xff] }
 0x22a   :  { %1536 = vmatpush.bf16.msra.mxu1 %v4107_v35 }
 0x22b   :  { %v957_v43 = vmax.f32 %v946_v0, 0.0  ;;  %v4106_v0 = vld [vmem:[#allocation2 + $0x2b0] sm:$0xff] }
 0x22d   :  { %v961_v47 = vpack.c.bf16 %v957_v43, %v957_v43  ;;  %v4097_v43 = vld [vmem:[#allocation2 + $0x268] sm:$0xff] }
 0x22e   :  { %1537 = vmatpush.bf16.msra.mxu1 %v4106_v0 }
 0x22f   :  { %v971_v52 = vunpack.c.l.b16 %v961_v47  ;;  %v4103_v47 = vld [vmem:[#allocation2 + $0x298] sm:$0xff] }
 0x230   :  { %v948_v44 = vpop.f32.mrf.mxu2 }
 0x231   :  { %v949_v46 = vadd.f32 %v948_v44, %v912_v41  ;;  %v4098_v41 = vld [vmem:[#allocation2 + $0x270] sm:$0xff]  ;;  %v4104_v44 = vld [vmem:[#allocation2 + $0x2a0] sm:$0xff] }
 0x232   :  { %1518 = vmatpush.bf16.msra.mxu0 %v4098_v41  ;;  %1538 = vmatpush.bf16.msra.mxu1 %v4105_v42 }
 0x233   :  { %v958_v49 = vmax.f32 %v949_v46, 0.0  ;;  %v4096_v46 = vld [vmem:[#allocation2 + $0x260] sm:$0xff] }
 0x235   :  { %v962_v51 = vpack.c.bf16 %v958_v49, %v958_v49  ;;  %v4095_v49 = vld [vmem:[#allocation2 + $0x258] sm:$0xff] }
 0x236   :  { %1519 = vmatpush.bf16.msra.mxu0 %v4097_v43  ;;  %1539 = vmatpush.bf16.msra.mxu1 %v4104_v44 }
 0x237   :  { %v972_v54 = vunpack.c.l.b16 %v962_v51 }
 0x238   :  { %v951_v57 = vpop.f32.mrf.mxu2 }
 0x239   :  { %v975_v59 = vpack.c.b16 %v972_v54, %v971_v52  ;;  %v952_v60 = vadd.f32 %v951_v57, %v913_v56  ;;  %v4115_v52 = vld [vmem:[#allocation2 + $0x2f8] sm:$0xff]  ;;  %v4094_v54 = vld [vmem:[#allocation2 + $0x250] sm:$0xff]  ;;  %v4101_v56 = vld [vmem:[#allocation2 + $0x288] sm:$0xff] }
 0x23a   :  { %1520 = vmatpush.bf16.msra.mxu0 %v4096_v46  ;;  %1540 = vmatpush.bf16.msra.mxu1 %v4103_v47  ;;  %v4114_v57 = vld [vmem:[#allocation2 + $0x2f0] sm:$0xff] }
 0x23b   :  { %v977_v61 = vrot.slane %v975_v59, 7  ;;  %1250 = vmatmul.bf16.vlgmr.msra.gmra.mxu2 %v975_v59  ;;  %v959_v63 = vmax.f32 %v952_v60, 0.0  ;;  %v4100_v59 = vld [vmem:[#allocation2 + $0x280] sm:$0xff] }
 0x23c   :  { %1555 = vmatpush.bf16.msrb.mxu2 %v4115_v52 }
 0x23d   :  { %v982_v62 = vsel %vm4773_vm14, 0, %v977_v61  ;;  %v963_v1 = vpack.c.bf16 %v959_v63, %v959_v63  ;;  %vm4783_vm14 = vmmov %vm4780_vm2 }
 0x23e   :  { %v987_v6 = vsel %vm4469_vm13, %v982_v62, 0  ;;  %v1012_v38 = vsel %vm4656_vm1, %v982_v62, 0  ;;  %1521 = vmatpush.bf16.msra.mxu0 %v4095_v49  ;;  %1541 = vmatpush.bf16.msra.mxu1 %v4102_v50  ;;  %v4092_v62 = vld [vmem:[#allocation2 + $0x240] sm:$0xff] }
 0x23f   :  { %1231 = vmatmul.bf16.vlgmr.msrb.gmra.mxu3 %v987_v6  ;;  %v973_v17 = vunpack.c.l.b16 %v963_v1  ;;  %v1020_v26 = vrot.slane %v1012_v38, 2  ;;  %v4112_v6 = vld [vmem:[#allocation2 + $0x2e0] sm:$0xff]  ;;  %v4110_v1 = vld [vmem:[#allocation2 + $0x2d0] sm:$0xff] }
 0x240   :  { %v954_v7 = vpop.f32.mrf.mxu2  ;;  %1556 = vmatpush.bf16.msrb.mxu2 %v4114_v57 }
 0x241   :  { %v955_v13 = vadd.f32 %v954_v7, %v914_v5  ;;  %v1075_v7 = vld [vmem:[#allocation6 + $0xd0] sm:$0xff] }
 0x242   :  { %1522 = vmatpush.bf16.msra.mxu0 %v4094_v54  ;;  %1542 = vmatpush.bf16.msra.mxu1 %v4101_v56 }
 0x243   :  { %v960_v15 = vmax.f32 %v955_v13, 0.0 }
 0x245   :  { %v964_v16 = vpack.c.bf16 %v960_v15, %v960_v15 }
 0x246   :  { %1523 = vmatpush.bf16.msra.mxu0 %v4093_v58  ;;  %1543 = vmatpush.bf16.msra.mxu1 %v4100_v59 }
 0x247   :  { %v974_v19 = vunpack.c.l.b16 %v964_v16 }
 0x249   :  { %v976_v20 = vpack.c.b16 %v974_v19, %v973_v17  ;;  %v4109_v17 = vld [vmem:[#allocation2 + $0x2c8] sm:$0xff] }
 0x24a   :  { %1524 = vmatpush.bf16.msra.mxu0 %v4092_v62 }
 0x24b   :  { %v978_v12 = vrot.slane %v976_v20, 7  ;;  %1255 = vmatmul.bf16.gmra.mxu2 %v976_v20 }
 0x24d   :  { %v979_v22 = vsel %vm4774_vm10, %v977_v61, %v978_v12  ;;  %v985_v31 = vsel %vm4778_vm11, %v978_v12, 0  ;;  %v4113_v61 = vld [vmem:[#allocation2 + $0x2e8] sm:$0xff]  ;;  %vm4784_vm10 = vmmov %vm4782_vm5 }
 0x24e   :  { %v988_v28 = vsel %vm4469_vm13, %v979_v22, 0  ;;  %v1013_v10 = vsel %vm4656_vm1, %v979_v22, 0  ;;  %v1014_v32 = vsel %vm4656_vm1, %v985_v31, 0  ;;  %1557 = vmatpush.bf16.msrb.mxu2 %v4113_v61 }
 0x24f   :  { %1236 = vmatmul.bf16.gmra.mxu3 %v988_v28  ;;  %v1021_v25 = vrot.slane %v1013_v10, 2  ;;  %v1023_v33 = vrot.slane %v1014_v32, 2 }
 0x251   :  { %v1022_v29 = vsel %vm4777_vm6, %v1020_v26, %v1021_v25  ;;  %v1024_v34 = vsel %vm4779_vm15, %v1021_v25, %v1023_v33  ;;  %v1078_v33 = vld [vmem:[#allocation6 + $0x100] sm:$0xff] }
 0x252   :  { %1558 = vmatpush.bf16.msrb.mxu2 %v4112_v6 }
 0x256   :  { %1559 = vmatpush.bf16.msrb.mxu2 %v4111_v4 }
 0x25a   :  { %1560 = vmatpush.bf16.msrb.mxu2 %v4110_v1 }
 0x25e   :  { %1561 = vmatpush.bf16.msrb.mxu2 %v4109_v17 }
 0x25f   :  { %1269 = vmatmul.bf16.vlgmr.msra.gmra.mxu3 %v1022_v29 }
 0x262   :  { %1562 = vmatpush.bf16.msrb.mxu2 %v4108_v21  ;;  %v4139_v21 = vld [vmem:[#allocation2 + $0x3b8] sm:$0xff] }
 0x266   :  { %1881 = vmatpush.bf16.msra.mxu2 %v4139_v21 }
 0x26f   :  { %1274 = vmatmul.bf16.gmra.mxu3 %v1024_v34 }
 0x2be   :  { %v1251_v5 = vpop.f32.mrf.mxu2 }
 0x2c2   :  { %v1232_v45 = vpop.f32.mrf.mxu3 }
 0x2c3   :  { %v1233_v13 = vadd.f32 %v1232_v45, %v1075_v7 }
 0x2c5   :  { %v1252_v16 = vadd.f32 %v1251_v5, %v1233_v13 }
 0x2c6   :  { %v1253_v18 = vpop.f32.mrf.mxu2 }
 0x2ca   :  { %v1234_v51 = vpop.f32.mrf.mxu3 }
 0x2cb   :  { %v1235_v19 = vadd.f32 %v1234_v51, %v1076_v14 }
 0x2cd   :  { %v1254_v12 = vadd.f32 %v1253_v18, %v1235_v19 }
 0x2ce   :  { %v1256_v25 = vpop.f32.mrf.mxu2 }
 0x2d2   :  { %v1237_v60 = vpop.f32.mrf.mxu3 }
 0x2d3   :  { %v1238_v26 = vadd.f32 %v1237_v60, %v1077_v27 }
 0x2d5   :  { %v1257_v35 = vadd.f32 %v1256_v25, %v1238_v26 }
 0x2d6   :  { %v1258_v44 = vpop.f32.mrf.mxu2 }
 0x2da   :  { %v1239_v63 = vpop.f32.mrf.mxu3 }
 0x2db   :  { %v1240_v0 = vadd.f32 %v1239_v63, %v1078_v33 }
 0x2dd   :  { %v1259_v46 = vadd.f32 %v1258_v44, %v1240_v0  ;;  %v4129_v0 = vld [vmem:[#allocation2 + $0x368] sm:$0xff]  ;;  %v4120_v44 = vld [vmem:[#allocation2 + $0x320] sm:$0xff] }
 0x2e2   :  { %v1270_v15 = vpop.f32.mrf.mxu3 }
 0x2e3   :  { %v1271_v20 = vadd.f32 %v1270_v15, %v1252_v16 }
 0x2e5   :  { %v1280_v22 = vmax.f32 %v1271_v20, 0.0 }
 0x2e7   :  { %v1284_v10 = vpack.c.bf16 %v1280_v22, %v1280_v22  ;;  %v4131_v22 = vld [vmem:[#allocation2 + $0x378] sm:$0xff] }
 0x2e8   :  { %1867 = vmatpush.bf16.msrb.mxu1 %v4131_v22 }
 0x2e9   :  { %v1292_v31 = vunpack.c.l.b16 %v1284_v10 }
 0x2ea   :  { %v1272_v28 = vpop.f32.mrf.mxu3 }
 0x2eb   :  { %v1273_v39 = vadd.f32 %v1272_v28, %v1254_v12  ;;  %v4123_v12 = vld [vmem:[#allocation2 + $0x338] sm:$0xff] }
 0x2ec   :  { %1853 = vmatpush.bf16.msrb.mxu0 %v4123_v12 }
 0x2ed   :  { %v1281_v38 = vmax.f32 %v1273_v39, 0.0  ;;  %v4138_v39 = vld [vmem:[#allocation2 + $0x3b0] sm:$0xff] }
 0x2ee   :  { %1882 = vmatpush.bf16.msra.mxu2 %v4138_v39 }
 0x2ef   :  { %v1285_v29 = vpack.c.bf16 %v1281_v38, %v1281_v38 }
 0x2f0   :  { %1854 = vmatpush.bf16.msrb.mxu0 %v4122_v53  ;;  %v4159_v53 = vld [vmem:[#allocation2 + $0x458] sm:$0xff] }
 0x2f1   :  { %v1293_v32 = vunpack.c.l.b16 %v1285_v29 }
 0x2f2   :  { %v1275_v34 = vpop.f32.mrf.mxu3 }
 0x2f3   :  { %v1296_v36 = vpack.c.b16 %v1293_v32, %v1292_v31  ;;  %v1276_v42 = vadd.f32 %v1275_v34, %v1257_v35 }
 0x2f5   :  { %v1298_v41 = vrot.slane %v1296_v36, 7  ;;  %1544 = vmatmul.bf16.vlgmr.msra.gmra.mxu1 %v1296_v36  ;;  %v1282_v47 = vmax.f32 %v1276_v42, 0.0  ;;  %v4128_v42 = vld [vmem:[#allocation2 + $0x360] sm:$0xff] }
 0x2f7   :  { %v1303_v43 = vsel %vm4780_vm2, 0, %v1298_v41  ;;  %v1286_v51 = vpack.c.bf16 %v1282_v47, %v1282_v47  ;;  %v4135_v47 = vld [vmem:[#allocation2 + $0x398] sm:$0xff] }
 0x2f8   :  { %v1308_v45 = vsel %vm4469_vm13, %v1303_v43, 0  ;;  %v1310_v60 = vsel %vm4656_vm1, %v1303_v43, 0  ;;  %v4137_v43 = vld [vmem:[#allocation2 + $0x3a8] sm:$0xff] }
 0x2f9   :  { %1525 = vmatmul.bf16.vlgmr.msra.gmra.mxu0 %v1308_v45  ;;  %v1294_v56 = vunpack.c.l.b16 %v1286_v51  ;;  %v1318_v5 = vrot.slane %v1310_v60, 2  ;;  %v4127_v45 = vld [vmem:[#allocation2 + $0x358] sm:$0xff]  ;;  %1883 = vmatpush.bf16.msra.mxu2 %v4137_v43  ;;  %v4134_v51 = vld [vmem:[#allocation2 + $0x390] sm:$0xff]  ;;  %v4141_v43 = vld [vmem:[#allocation2 + $0x3c8] sm:$0xff] }
 0x2fa   :  { %v1277_v49 = vpop.f32.mrf.mxu3  ;;  %v4147_v60 = vld [vmem:[#allocation2 + $0x3f8] sm:$0xff] }
 0x2fb   :  { %v1278_v50 = vadd.f32 %v1277_v49, %v1259_v46  ;;  %v4126_v46 = vld [vmem:[#allocation2 + $0x350] sm:$0xff] }
 0x2fc   :  { %v4118_v49 = vld [vmem:[#allocation2 + $0x310] sm:$0xff] }
 0x2fd   :  { %v1283_v52 = vmax.f32 %v1278_v50, 0.0  ;;  %v4125_v50 = vld [vmem:[#allocation2 + $0x348] sm:$0xff] }
 0x2ff   :  { %v1287_v54 = vpack.c.bf16 %v1283_v52, %v1283_v52  ;;  %v4117_v52 = vld [vmem:[#allocation2 + $0x308] sm:$0xff] }
 0x301   :  { %v1295_v57 = vunpack.c.l.b16 %v1287_v54  ;;  %v4124_v54 = vld [vmem:[#allocation2 + $0x340] sm:$0xff] }
 0x303   :  { %v1297_v58 = vpack.c.b16 %v1295_v57, %v1294_v56  ;;  %v4133_v56 = vld [vmem:[#allocation2 + $0x388] sm:$0xff]  ;;  %v4116_v57 = vld [vmem:[#allocation2 + $0x300] sm:$0xff] }
 0x305   :  { %v1299_v59 = vrot.slane %v1297_v58, 7  ;;  %1549 = vmatmul.bf16.gmra.mxu1 %v1297_v58  ;;  %v4132_v58 = vld [vmem:[#allocation2 + $0x380] sm:$0xff] }
 0x307   :  { %v1300_v61 = vsel %vm4781_vm4, %v1298_v41, %v1299_v59  ;;  %v1306_v7 = vsel %vm4783_vm14, %v1299_v59, 0  ;;  %v4121_v41 = vld [vmem:[#allocation2 + $0x328] sm:$0xff]  ;;  %v4155_v59 = vld [vmem:[#allocation2 + $0x438] sm:$0xff]  ;;  %vm1622_vm4 = vcmp.ge.s32.totalorder %v4401_v2, 4 }
 0x308   :  { %v1309_v62 = vsel %vm4469_vm13, %v1300_v61, 0  ;;  %v1311_v6 = vsel %vm4656_vm1, %v1300_v61, 0  ;;  %v1312_v13 = vsel %vm4656_vm1, %v1306_v7, 0  ;;  %vm892_vm13 = vcmp.eq.s32.totalorder %v4619_v8, 4294967295  ;;  %v4130_v8 = vld [vmem:[#allocation2 + $0x370] sm:$0xff]  ;;  %1855 = vmatpush.bf16.msrb.mxu0 %v4121_v41  ;;  %vm4700_vm14 = vmpackc.low %vm1622_vm4, %vm1622_vm4  ;;  %v4149_v41 = vld [vmem:[#allocation2 + $0x408] sm:$0xff] }
 0x309   :  { %v1319_v63 = vrot.slane %v1311_v6, 2  ;;  %1530 = vmatmul.bf16.gmra.mxu0 %v1309_v62  ;;  %v1321_v1 = vrot.slane %v1312_v13, 2  ;;  %vm1579_vm3 = vmand %vm1575_vm8, %vm892_vm13  ;;  %vm1588_vm1 = vcmask 261120   ;;  %1868 = vmatpush.bf16.msrb.mxu1 %v4130_v8  ;;  %v4154_v61 = vld [vmem:[#allocation2 + $0x430] sm:$0xff]  ;;  %vm1654_vm8 = vcmask 1043456  }
 0x30a   :  { %vm1581_vm6 = vmxor %vm1579_vm3, %vm4357_vm0  ;;  %vm1623_vm0 = vcmp.lt.s32.totalorder %v4401_v2, 4  ;;  %v1586_v62 = vld [vmem:[#allocation6 + $0x110] sm:$0xff] }
 0x30b   :  { %v1320_v4 = vsel %vm4782_vm5, %v1318_v5, %v1319_v63  ;;  %v1322_v14 = vsel %vm4784_vm10, %v1319_v63, %v1321_v1  ;;  %vm1583_vm11 = vmand %vm4630_vm12, %vm1581_vm6  ;;  %vm4789_vm10 = vcmask 1041408   ;;  %v4150_v8 = vld [vmem:[#allocation2 + $0x410] sm:$0xff] }
 0x30c   :  { %1563 = vmatmul.bf16.vlgmr.msrb.gmra.mxu2 %v1320_v4  ;;  %v1585_v36 = vsel %vm1583_vm11, 0.33333334, %v4359_v9  ;;  %1856 = vmatpush.bf16.msrb.mxu0 %v4120_v44  ;;  %vm1638_vm12 = vmpackc.low %vm1623_vm0, %vm1623_vm0  ;;  %v1587_v4 = vld [vmem:[#allocation6 + $0x120] sm:$0xff]  ;;  %vm2161_vm11 = vcmask 130048   ;;  %vm2239_vm0 = vcmask 1041409  }
 0x30d   :  { %1869 = vmatpush.bf16.msrb.mxu1 %v4129_v0  ;;  %v1639_v63 = vsel %vm1638_vm12, 65537, %v4358_v3  ;;  %vm4790_vm13 = vmmov %vm4789_vm10  ;;  %v4142_v0 = vld [vmem:[#allocation2 + $0x3d0] sm:$0xff]  ;;  %v4148_v44 = vld [vmem:[#allocation2 + $0x400] sm:$0xff] }
 0x30e   :  { %v1640_v13 = vunpack.c.l.b16 %v1639_v63  ;;  %vm4791_vm3 = vmmov %vm4789_vm10  ;;  %v3674_v3 = vld [vmem:[#allocation4 + $0xd0] sm:$0xf] }
 0x30f   :  { %vm4793_vm6 = vmand %vm4583_vm7, %vm4593_vm9  ;;  %vm2192_vm7 = vcmask 1043458  }
 0x310   :  { %1857 = vmatpush.bf16.msrb.mxu0 %v4119_v48  ;;  %v4156_v48 = vld [vmem:[#allocation2 + $0x440] sm:$0xff] }
 0x311   :  { %1870 = vmatpush.bf16.msrb.mxu1 %v4128_v42  ;;  %v4158_v42 = vld [vmem:[#allocation2 + $0x450] sm:$0xff] }
 0x314   :  { %1858 = vmatpush.bf16.msrb.mxu0 %v4118_v49 }
 0x315   :  { %1871 = vmatpush.bf16.msrb.mxu1 %v4127_v45  ;;  %v4157_v45 = vld [vmem:[#allocation2 + $0x448] sm:$0xff] }
 0x318   :  { %1859 = vmatpush.bf16.msrb.mxu0 %v4117_v52  ;;  %v1708_v52 = vld [vmem:[#allocation6 + $0x140] sm:$0xff] }
 0x319   :  { %1872 = vmatpush.bf16.msrb.mxu1 %v4126_v46 }
 0x31c   :  { %1568 = vmatmul.bf16.gmra.mxu2 %v1322_v14  ;;  %1860 = vmatpush.bf16.msrb.mxu0 %v4116_v57 }
 0x31d   :  { %1873 = vmatpush.bf16.msrb.mxu1 %v4125_v50 }
 0x320   :  { %2126 = vmatpush.bf16.msra.mxu0 %v4155_v59 }
 0x321   :  { %1874 = vmatpush.bf16.msrb.mxu1 %v4124_v54 }
 0x324   :  { %2127 = vmatpush.bf16.msra.mxu0 %v4154_v61 }
 0x372   :  { %v1545_v15 = vpop.f32.mrf.mxu1 }
 0x376   :  { %v1526_v55 = vpop.f32.mrf.mxu0 }
 0x377   :  { %v1546_v33 = vadd.f32 %v1545_v15, %v1526_v55 }
 0x37a   :  { %v1547_v18 = vpop.f32.mrf.mxu1 }
 0x37e   :  { %v1528_v16 = vpop.f32.mrf.mxu0 }
 0x37f   :  { %v1548_v31 = vadd.f32 %v1547_v18, %v1528_v16  ;;  %v3437_v16 = vunpack.i.l.s16 %v1640_v13 }
 0x381   :  { %vm1646_vm15 = vcmp.ne.s32.totalorder %v3437_v16, %v4421_v24  ;;  %vm1647_vm2 = vcmp.ne.s32.totalorder %v3437_v16, %v4429_v30 }
 0x382   :  { %v1550_v28 = vpop.f32.mrf.mxu1  ;;  %vm4696_vm5 = vmpackc.low %vm1647_vm2, %vm1646_vm15  ;;  %vm3023_vm2 = vcmask 1024  }
 0x386   :  { %v1531_v20 = vpop.f32.mrf.mxu0 }
 0x387   :  { %v1551_v26 = vadd.f32 %v1550_v28, %v1531_v20 }
 0x38a   :  { %v1552_v10 = vpop.f32.mrf.mxu1 }
 0x38e   :  { %v1533_v27 = vpop.f32.mrf.mxu0 }
 0x38f   :  { %v1564_v17 = vpop.f32.mrf.mxu2  ;;  %v1553_v38 = vadd.f32 %v1552_v10, %v1533_v27  ;;  %v4146_v10 = vld [vmem:[#allocation2 + $0x3f0] sm:$0xff] }
 0x390   :  { %v1565_v35 = vadd.f32 %v1564_v17, %v1546_v33  ;;  %v4144_v33 = vld [vmem:[#allocation2 + $0x3e0] sm:$0xff] }
 0x397   :  { %v1566_v19 = vpop.f32.mrf.mxu2 }
 0x398   :  { %v1567_v34 = vadd.f32 %v1566_v19, %v1548_v31  ;;  %v4152_v31 = vld [vmem:[#allocation2 + $0x420] sm:$0xff] }
 0x39f   :  { %v1569_v23 = vpop.f32.mrf.mxu2 }
 0x3a0   :  { %v1570_v32 = vadd.f32 %v1569_v23, %v1551_v26  ;;  %v4162_v26 = vld [vmem:[#allocation2 + $0x470] sm:$0xff] }
 0x3a7   :  { %v1571_v25 = vpop.f32.mrf.mxu2 }
 0x3a8   :  { %v1572_v29 = vadd.f32 %v1571_v25, %v1553_v38  ;;  %v4163_v38 = vld [vmem:[#allocation2 + $0x478] sm:$0xff]  ;;  %v4153_v25 = vld [vmem:[#allocation2 + $0x428] sm:$0xff] }
 0x3a9   :  { %2140 = vmatpush.bf16.msra.mxu1 %v4163_v38  ;;  %2128 = vmatpush.bf16.msra.mxu0 %v4153_v25  ;;  %v3756_v38 = vld [vmem:[#allocation4 + $0x1f8] sm:$0xf0]  ;;  %v4191_v25 = vld [vmem:[#allocation4 + $0xd4] sm:$0xf0] }
 0x3aa   :  { %1607 = vmatpush.msrb.mxu3 %v1572_v29  ;;  %v4145_v29 = vld [vmem:[#allocation2 + $0x3e8] sm:$0xff] }
 0x3ac   :  { %1608 = vmatpush.msrb.mxu3 %v1570_v32  ;;  %v4161_v32 = vld [vmem:[#allocation2 + $0x468] sm:$0xff] }
 0x3ad   :  { %2141 = vmatpush.bf16.msra.mxu1 %v4162_v26  ;;  %2129 = vmatpush.bf16.msra.mxu0 %v4152_v31  ;;  %v3746_v31 = vld [vmem:[#allocation4 + $0x1e0] sm:$0xf] }
 0x3ae   :  { %1609 = vmatpush.msrb.mxu3 %v1567_v34  ;;  %v4151_v34 = vld [vmem:[#allocation2 + $0x418] sm:$0xff] }
 0x3b0   :  { %1610 = vmatpush.msrb.mxu3 %v1565_v35  ;;  %v4160_v35 = vld [vmem:[#allocation2 + $0x460] sm:$0xff] }
 0x3b1   :  { %3435 = vmatmul.msk.f32.vlgmr.msrb.gmra.mxu3 %vm1588_vm1, %v4622_v11  ;;  %v4136_v11 = vld [vmem:[#allocation2 + $0x3a0] sm:$0xff]  ;;  %2142 = vmatpush.bf16.msra.mxu1 %v4161_v32  ;;  %v4225_v32 = vld [vmem:[#allocation4 + $0x1e4] sm:$0xf0] }
 0x3b2   :  { %1884 = vmatpush.bf16.msra.mxu2 %v4136_v11  ;;  %2112 = vmatpush.bf16.msra.mxu3 %v4147_v60  ;;  %v4140_v11 = vld [vmem:[#allocation2 + $0x3c0] sm:$0xff] }
 0x3b3   :  { %2130 = vmatpush.bf16.msra.mxu0 %v4151_v34  ;;  %v3747_v34 = vor.u32 %v4225_v32, %v3746_v31  ;;  %v4182_v32 = vld [vmem:[#allocation4 + $0x94] sm:$0xf] }
 0x3b5   :  { %2143 = vmatpush.bf16.msra.mxu1 %v4160_v35  ;;  %v3748_v35 = vld [vmem:[#allocation4 + $0x1e8] sm:$0xf0] }
 0x3b6   :  { %1885 = vmatpush.bf16.msra.mxu2 %v4135_v47  ;;  %2113 = vmatpush.bf16.msra.mxu3 %v4146_v10  ;;  %v1707_v47 = vld [vmem:[#allocation6 + $0x130] sm:$0xff] }
 0x3b7   :  { %2131 = vmatpush.bf16.msra.mxu0 %v4150_v8  ;;  %v4189_v8 = vld [vmem:[#allocation4 + $0xc4] sm:$0xf0] }
 0x3b9   :  { %3436 = vmatmul.msk.f32.gmra.mxu3 %vm1588_vm1, %v1585_v36  ;;  %v4143_v36 = vld [vmem:[#allocation2 + $0x3d8] sm:$0xff]  ;;  %2144 = vmatpush.bf16.msra.mxu1 %v4159_v53  ;;  %vm4792_vm1 = vmmov %vm4791_vm3 }
 0x3ba   :  { %1886 = vmatpush.bf16.msra.mxu2 %v4134_v51  ;;  %2114 = vmatpush.bf16.msra.mxu3 %v4145_v29  ;;  %v3675_v29 = vor.u32 %v4191_v25, %v3674_v3  ;;  %v3724_v3 = vld [vmem:[#allocation4 + $0x1b8] sm:$0xf0]  ;;  %v3642_v25 = vld [vmem:[#allocation4 + $0x90] sm:$0xf]  ;;  %vm4794_vm9 = vmmov %vm4792_vm1 }
 0x3bb   :  { %2132 = vmatpush.bf16.msra.mxu0 %v4149_v41  ;;  %v3738_v41 = vld [vmem:[#allocation4 + $0x1d0] sm:$0xf]  ;;  %vm4795_vm12 = vmmov %vm4792_vm1 }
 0x3bc   :  { %vm4796_vm15 = vmmov %vm4792_vm1 }
 0x3bd   :  { %2145 = vmatpush.bf16.msra.mxu1 %v4158_v42  ;;  %v4223_v42 = vld [vmem:[#allocation4 + $0x1d4] sm:$0xf0] }
 0x3be   :  { %1887 = vmatpush.bf16.msra.mxu2 %v4133_v56  ;;  %2115 = vmatpush.bf16.msra.mxu3 %v4144_v33  ;;  %v4224_v33 = vld [vmem:[#allocation4 + $0x1e4] sm:$0xf] }
 0x3bf   :  { %2133 = vmatpush.bf16.msra.mxu0 %v4148_v44  ;;  %v3751_v53 = vor.u32 %v4224_v33, %v3748_v35  ;;  %v3644_v33 = vld [vmem:[#allocation4 + $0x98] sm:$0xf0]  ;;  %v3714_v35 = vld [vmem:[#allocation4 + $0x1a0] sm:$0xf] }
 0x3c1   :  { %2146 = vmatpush.bf16.msra.mxu1 %v4157_v45  ;;  %v3739_v45 = vor.u32 %v4223_v42, %v3738_v41  ;;  %v3634_v41 = vld [vmem:[#allocation4 + $0x80] sm:$0xf] }
 0x3c2   :  { %1888 = vmatpush.bf16.msra.mxu2 %v4132_v58  ;;  %2116 = vmatpush.bf16.msra.mxu3 %v4143_v36  ;;  %v3666_v36 = vld [vmem:[#allocation4 + $0xc0] sm:$0xf] }
 0x3c5   :  { %2147 = vmatpush.bf16.msra.mxu1 %v4156_v48 }
 0x3c6   :  { %2117 = vmatpush.bf16.msra.mxu3 %v4142_v0  ;;  %v3667_v0 = vor.u32 %v4189_v8, %v3666_v36  ;;  %v4217_v36 = vld [vmem:[#allocation4 + $0x1a4] sm:$0xf0] }
 0x3c7   :  { %v3715_v8 = vor.u32 %v4217_v36, %v3714_v35  ;;  %v3868_v35 = vld [vmem:[#allocation4 + $0x158] sm:$0xf0]  ;;  %v3786_v36 = vld [vmem:[#allocation4 + $0x30] sm:$0xf] }
 0x3ca   :  { %2118 = vmatpush.bf16.msra.mxu3 %v4141_v43  ;;  %v4222_v43 = vld [vmem:[#allocation4 + $0x1d4] sm:$0xf] }
 0x3ce   :  { %2119 = vmatpush.bf16.msra.mxu3 %v4140_v11  ;;  %v3740_v11 = vld [vmem:[#allocation4 + $0x1d8] sm:$0xf0] }
 0x3cf   :  { %v3743_v48 = vor.u32 %v4222_v43, %v3740_v11  ;;  %v4181_v43 = vld [vmem:[#allocation4 + $0x84] sm:$0xf0] }
 0x3d0   :  { %v3635_v11 = vor.u32 %v4181_v43, %v3634_v41  ;;  %v4170_v41 = vld [vmem:[#allocation4 + $0x34] sm:$0xf] }
 0x434   :  { %v1612_v6 = vpop.f32.mrf.mxu3 }
 0x435   :  { %v1613_v5 = vadd.f32 %v1612_v6, %v1586_v62 }
 0x437   :  { %v1618_v7 = vmax.f32 %v1613_v5, 0.0 }
 0x439   :  { %v1620_v55 = vpack.c.bf16 %v1618_v7, %v1618_v7 }
 0x43b   :  { %v1626_v18 = vunpack.c.l.b16 %v1620_v55 }
 0x43c   :  { %v1615_v1 = vpop.f32.mrf.mxu3 }
 0x43d   :  { %v1616_v14 = vadd.f32 %v1615_v1, %v1587_v4 }
 0x43f   :  { %v1619_v15 = vmax.f32 %v1616_v14, 0.0 }
 0x441   :  { %v1621_v17 = vpack.c.bf16 %v1619_v15, %v1619_v15 }
 0x443   :  { %v1627_v19 = vunpack.c.l.b16 %v1621_v17 }
 0x445   :  { %v1628_v20 = vpack.c.b16 %v1627_v19, %v1626_v18 }
 0x447   :  { %v1629_v21 = vrot.slane %v1628_v20, 6  ;;  %1875 = vmatmul.bf16.vlgmr.msrb.gmra.mxu1 %v1628_v20 }
 0x449   :  { %v1632_v22 = vsel %vm4789_vm10, 0, %v1629_v21  ;;  %v1634_v28 = vsel %vm4790_vm13, %v1629_v21, 0 }
 0x44a   :  { %v1649_v24 = vsel %vm4696_vm5, %v1632_v22, 0  ;;  %v1650_v2 = vsel %vm4696_vm5, %v1634_v28, 0  ;;  %v1637_v30 = vsel %vm4700_vm14, %v1632_v22, 0  ;;  %v3690_v22 = vld [vmem:[#allocation4 + $0xf0] sm:$0xf] }
 0x44b   :  { %v1655_v39 = vrot.slane %v1649_v24, 4  ;;  %v1656_v23 = vrot.slane %v1650_v2, 4  ;;  %1861 = vmatmul.bf16.vlgmr.msrb.gmra.mxu0 %v1637_v30  ;;  %v4195_v28 = vld [vmem:[#allocation4 + $0xf4] sm:$0xf0]  ;;  %v3682_v2 = vld [vmem:[#allocation4 + $0xe0] sm:$0xf] }
 0x44c   :  { %v3691_v24 = vor.u32 %v4195_v28, %v3690_v22  ;;  %v4193_v30 = vld [vmem:[#allocation4 + $0xe4] sm:$0xf0]  ;;  %v3650_v22 = vld [vmem:[#allocation4 + $0xa0] sm:$0xf] }
 0x44d   :  { %v1657_v27 = vsel %vm1654_vm8, %v1655_v39, %v1656_v23  ;;  %v3683_v12 = vor.u32 %v4193_v30, %v3682_v2  ;;  %v3754_v39 = vld [vmem:[#allocation4 + $0x1f0] sm:$0xf]  ;;  %v4227_v23 = vld [vmem:[#allocation4 + $0x1f4] sm:$0xf0]  ;;  %v4185_v28 = vld [vmem:[#allocation4 + $0xa4] sm:$0xf0] }
 0x44e   :  { %1889 = vmatmul.bf16.vlgmr.msra.gmra.mxu2 %v1657_v27  ;;  %2323 = vmatpush.bf16.msrb.mxu3 %v3691_v24  ;;  %v4226_v27 = vld [vmem:[#allocation4 + $0x1f4] sm:$0xf]  ;;  %v3755_v10 = vor.u32 %v4227_v23, %v3754_v39  ;;  %v3651_v2 = vor.u32 %v4185_v28, %v3650_v22  ;;  %v4184_v30 = vld [vmem:[#allocation4 + $0xa4] sm:$0xf]  ;;  %v3722_v23 = vld [vmem:[#allocation4 + $0x1b0] sm:$0xf] }
 0x44f   :  { %v3759_v26 = vor.u32 %v4226_v27, %v3756_v38  ;;  %v4219_v27 = vld [vmem:[#allocation4 + $0x1b4] sm:$0xf0]  ;;  %v3804_v22 = vld [vmem:[#allocation4 + $0x58] sm:$0xf0] }
 0x450   :  { %2475 = vmatpush.bf16.msrb.mxu0 %v3755_v10  ;;  %v4218_v10 = vld [vmem:[#allocation4 + $0x1b4] sm:$0xf]  ;;  %v3723_v38 = vor.u32 %v4219_v27, %v3722_v23  ;;  %v3876_v23 = vld [vmem:[#allocation4 + $0x168] sm:$0xf0]  ;;  %v3794_v27 = vld [vmem:[#allocation4 + $0x40] sm:$0xf] }
 0x451   :  { %2488 = vmatpush.bf16.msrb.mxu1 %v3759_v26  ;;  %v4183_v26 = vld [vmem:[#allocation4 + $0x94] sm:$0xf0] }
 0x452   :  { %2324 = vmatpush.bf16.msrb.mxu3 %v3683_v12  ;;  %v3652_v12 = vld [vmem:[#allocation4 + $0xa8] sm:$0xf0]  ;;  %v3643_v31 = vor.u32 %v4183_v26, %v3642_v25  ;;  %v4172_v25 = vld [vmem:[#allocation4 + $0x44] sm:$0xf] }
 0x453   :  { %v3655_v39 = vor.u32 %v4184_v30, %v3652_v12  ;;  %v4209_v30 = vld [vmem:[#allocation4 + $0x164] sm:$0xf0]  ;;  %v4208_v12 = vld [vmem:[#allocation4 + $0x164] sm:$0xf]  ;;  %v3796_v26 = vld [vmem:[#allocation4 + $0x48] sm:$0xf0] }
 0x454   :  { %2476 = vmatpush.bf16.msrb.mxu0 %v3747_v34  ;;  %v3647_v34 = vor.u32 %v4182_v32, %v3644_v33  ;;  %v4207_v32 = vld [vmem:[#allocation4 + $0x154] sm:$0xf0]  ;;  %v4206_v33 = vld [vmem:[#allocation4 + $0x154] sm:$0xf] }
 0x455   :  { %2489 = vmatpush.bf16.msrb.mxu1 %v3751_v53  ;;  %v4216_v53 = vld [vmem:[#allocation4 + $0x1a4] sm:$0xf] }
 0x456   :  { %2325 = vmatpush.bf16.msrb.mxu3 %v3675_v29  ;;  %v3727_v29 = vor.u32 %v4218_v10, %v3724_v3  ;;  %v4173_v10 = vld [vmem:[#allocation4 + $0x44] sm:$0xf0] }
 0x457   :  { %v3795_v3 = vor.u32 %v4173_v10, %v3794_v27  ;;  %v3836_v10 = vld [vmem:[#allocation4 + $0x118] sm:$0xf0] }
 0x458   :  { %2477 = vmatpush.bf16.msrb.mxu0 %v3739_v45  ;;  %v3636_v45 = vld [vmem:[#allocation4 + $0x88] sm:$0xf0] }
 0x459   :  { %2490 = vmatpush.bf16.msrb.mxu1 %v3743_v48 }
 0x45a   :  { %2326 = vmatpush.bf16.msrb.mxu3 %v3667_v0  ;;  %v3716_v0 = vld [vmem:[#allocation4 + $0x1a8] sm:$0xf0] }
 0x45b   :  { %v3719_v42 = vor.u32 %v4216_v53, %v3716_v0  ;;  %v3871_v53 = vor.u32 %v4206_v33, %v3868_v35 }
 0x4c4   :  { %v1876_v49 = vpop.f32.mrf.mxu1 }
 0x4c8   :  { %v1862_v46 = vpop.f32.mrf.mxu0 }
 0x4c9   :  { %v1863_v50 = vadd.f32 %v1862_v46, %v1707_v47 }
 0x4cb   :  { %v1877_v56 = vadd.f32 %v1876_v49, %v1863_v50 }
 0x4cc   :  { %v1878_v59 = vpop.f32.mrf.mxu1 }
 0x4d0   :  { %v1864_v54 = vpop.f32.mrf.mxu0 }
 0x4d1   :  { %v1890_v51 = vpop.f32.mrf.mxu2  ;;  %v1865_v58 = vadd.f32 %v1864_v54, %v1708_v52 }
 0x4d2   :  { %v1891_v57 = vadd.f32 %v1890_v51, %v1877_v56  ;;  %v4194_v56 = vld [vmem:[#allocation4 + $0xf4] sm:$0xf] }
 0x4d3   :  { %v1879_v61 = vadd.f32 %v1878_v59, %v1865_v58 }
 0x4d4   :  { %v1895_v60 = vmax.f32 %v1891_v57, 0.0  ;;  %v3692_v57 = vld [vmem:[#allocation4 + $0xf8] sm:$0xf0] }
 0x4d6   :  { %v1897_v5 = vpack.c.bf16 %v1895_v60, %v1895_v60  ;;  %v2159_v60 = vsel %vm4793_vm6, 0.33333334, %v4359_v9  ;;  %v4186_v9 = vld [vmem:[#allocation4 + $0xb4] sm:$0xf] }
 0x4d8   :  { %v1901_v7 = vunpack.c.l.b16 %v1897_v5 }
 0x4d9   :  { %v1892_v62 = vpop.f32.mrf.mxu2 }
 0x4da   :  { %v1893_v6 = vadd.f32 %v1892_v62, %v1879_v61  ;;  %v3695_v61 = vor.u32 %v4194_v56, %v3692_v57  ;;  %v4192_v62 = vld [vmem:[#allocation4 + $0xe4] sm:$0xf] }
 0x4dc   :  { %v1896_v63 = vmax.f32 %v1893_v6, 0.0  ;;  %v3684_v6 = vld [vmem:[#allocation4 + $0xe8] sm:$0xf0] }
 0x4dd   :  { %v3687_v5 = vor.u32 %v4192_v62, %v3684_v6  ;;  %v4177_v62 = vld [vmem:[#allocation4 + $0x64] sm:$0xf0]  ;;  %v4176_v6 = vld [vmem:[#allocation4 + $0x64] sm:$0xf] }
 0x4de   :  { %v1898_v4 = vpack.c.bf16 %v1896_v63, %v1896_v63  ;;  %v4190_v63 = vld [vmem:[#allocation4 + $0xd4] sm:$0xf] }
 0x4e0   :  { %v1902_v13 = vunpack.c.l.b16 %v1898_v4  ;;  %v3676_v4 = vld [vmem:[#allocation4 + $0xd8] sm:$0xf0] }
 0x4e2   :  { %v1903_v1 = vpack.c.b16 %v1902_v13, %v1901_v7  ;;  %v3679_v7 = vor.u32 %v4190_v63, %v3676_v4  ;;  %v4188_v13 = vld [vmem:[#allocation4 + $0xc4] sm:$0xf] }
 0x4e4   :  { %v1904_v14 = vrot.slane %v1903_v1, 6  ;;  %2134 = vmatmul.bf16.vlgmr.msra.gmra.mxu0 %v1903_v1  ;;  %v3668_v1 = vld [vmem:[#allocation4 + $0xc8] sm:$0xf0] }
 0x4e5   :  { %v3671_v37 = vor.u32 %v4188_v13, %v3668_v1  ;;  %v4213_v13 = vld [vmem:[#allocation4 + $0x184] sm:$0xf0]  ;;  %v4212_v1 = vld [vmem:[#allocation4 + $0x184] sm:$0xf] }
 0x4e6   :  { %v1908_v55 = vsel %vm4791_vm3, %v1904_v14, 0  ;;  %v1906_v15 = vsel %vm4792_vm1, 0, %v1904_v14  ;;  %v4187_v14 = vld [vmem:[#allocation4 + $0xb4] sm:$0xf0] }
 0x4e7   :  { %v1910_v16 = vsel %vm4700_vm14, %v1906_v15, 0  ;;  %v1911_v17 = vsel %vm4696_vm5, %v1906_v15, 0  ;;  %v1912_v18 = vsel %vm4696_vm5, %v1908_v55, 0  ;;  %v3659_v55 = vor.u32 %v4187_v14, %v3658_v40  ;;  %v3660_v15 = vld [vmem:[#allocation4 + $0xb8] sm:$0xf0] }
 0x4e8   :  { %v1916_v19 = vrot.slane %v1911_v17, 4  ;;  %2120 = vmatmul.bf16.vlgmr.msra.gmra.mxu3 %v1910_v16  ;;  %v1917_v20 = vrot.slane %v1912_v18, 4  ;;  %v3663_v16 = vor.u32 %v4186_v9, %v3660_v15  ;;  %v3730_v17 = vld [vmem:[#allocation4 + $0x1c0] sm:$0xf]  ;;  %v4221_v18 = vld [vmem:[#allocation4 + $0x1c4] sm:$0xf0] }
 0x4e9   :  { %2327 = vmatpush.bf16.msrb.mxu3 %v3659_v55  ;;  %v3700_v40 = vld [vmem:[#allocation4 + $0x188] sm:$0xf0]  ;;  %v3882_v14 = vld [vmem:[#allocation4 + $0x170] sm:$0xf]  ;;  %v4211_v9 = vld [vmem:[#allocation4 + $0x174] sm:$0xf0] }
 0x4ea   :  { %v1918_v21 = vsel %vm1654_vm8, %v1916_v19, %v1917_v20  ;;  %v4220_v19 = vld [vmem:[#allocation4 + $0x1c4] sm:$0xf]  ;;  %v3731_v20 = vor.u32 %v4221_v18, %v3730_v17  ;;  %v3703_v55 = vor.u32 %v4212_v1, %v3700_v40  ;;  %v3883_v15 = vor.u32 %v4211_v9, %v3882_v14  ;;  %v3884_v17 = vld [vmem:[#allocation4 + $0x178] sm:$0xf0]  ;;  %v3802_v18 = vld [vmem:[#allocation4 + $0x50] sm:$0xf] }
 0x4eb   :  { %2148 = vmatmul.bf16.vlgmr.msra.gmra.mxu1 %v1918_v21  ;;  %v3732_v21 = vld [vmem:[#allocation4 + $0x1c8] sm:$0xf0]  ;;  %v3772_v40 = vld [vmem:[#allocation4 + $0x18] sm:$0xf0]  ;;  %v3842_v9 = vld [vmem:[#allocation4 + $0x120] sm:$0xf] }
 0x4ec   :  { %v3735_v24 = vor.u32 %v4220_v19, %v3732_v21  ;;  %2478 = vmatpush.bf16.msrb.mxu0 %v3731_v20  ;;  %v4175_v20 = vld [vmem:[#allocation4 + $0x54] sm:$0xf0]  ;;  %v4174_v21 = vld [vmem:[#allocation4 + $0x54] sm:$0xf] }
 0x4ed   :  { %2328 = vmatpush.bf16.msrb.mxu3 %v3651_v2  ;;  %v3803_v28 = vor.u32 %v4175_v20, %v3802_v18  ;;  %v3874_v2 = vld [vmem:[#allocation4 + $0x160] sm:$0xf]  ;;  %v3844_v18 = vld [vmem:[#allocation4 + $0x128] sm:$0xf0]  ;;  %v4165_v20 = vld [vmem:[#allocation4 + $0x4] sm:$0xf0] }
 0x4ee   :  { %2491 = vmatpush.bf16.msrb.mxu1 %v3735_v24  ;;  %v3807_v24 = vor.u32 %v4174_v21, %v3804_v22 }
 0x4f0   :  { %2479 = vmatpush.bf16.msrb.mxu0 %v3723_v38  ;;  %v3879_v38 = vor.u32 %v4208_v12, %v3876_v23  ;;  %v4198_v23 = vld [vmem:[#allocation4 + $0x114] sm:$0xf] }
 0x4f1   :  { %2329 = vmatpush.bf16.msrb.mxu3 %v3643_v31  ;;  %v3866_v31 = vld [vmem:[#allocation4 + $0x150] sm:$0xf] }
 0x4f2   :  { %2492 = vmatpush.bf16.msrb.mxu1 %v3727_v29  ;;  %v3799_v29 = vor.u32 %v4172_v25, %v3796_v26  ;;  %v3839_v25 = vor.u32 %v4198_v23, %v3836_v10  ;;  %v4256_v23 = vld [vmem:[#allocation4 + $0x2e4] sm:$0xf] }
 0x4f4   :  { %2480 = vmatpush.bf16.msrb.mxu0 %v3715_v8  ;;  %v4171_v8 = vld [vmem:[#allocation4 + $0x34] sm:$0xf0] }
 0x4f5   :  { %2330 = vmatpush.bf16.msrb.mxu3 %v3635_v11  ;;  %v3787_v0 = vor.u32 %v4171_v8, %v3786_v36  ;;  %v4204_v11 = vld [vmem:[#allocation4 + $0x144] sm:$0xf] }
 0x4f6   :  { %2493 = vmatpush.bf16.msrb.mxu1 %v3719_v42  ;;  %v3788_v42 = vld [vmem:[#allocation4 + $0x38] sm:$0xf0] }
 0x4f7   :  { %v3791_v43 = vor.u32 %v4170_v41, %v3788_v42 }
 0x561   :  { %v2135_v44 = vpop.f32.mrf.mxu0 }
 0x568   :  { %v2149_v46 = vpop.f32.mrf.mxu1 }
 0x569   :  { %v2137_v49 = vpop.f32.mrf.mxu0 }
 0x56b   :  { %v2121_v47 = vpop.f32.mrf.mxu3 }
 0x56c   :  { %v2136_v51 = vadd.f32 %v2135_v44, %v2121_v47  ;;  %v4180_v44 = vld [vmem:[#allocation4 + $0x84] sm:$0xf]  ;;  %v4179_v47 = vld [vmem:[#allocation4 + $0x74] sm:$0xf0] }
 0x56d   :  { %v3639_v48 = vor.u32 %v4180_v44, %v3636_v45  ;;  %v3858_v44 = vld [vmem:[#allocation4 + $0x140] sm:$0xf]  ;;  %v4205_v45 = vld [vmem:[#allocation4 + $0x144] sm:$0xf0] }
 0x56e   :  { %v2150_v59 = vadd.f32 %v2149_v46, %v2136_v51  ;;  %v3818_v46 = vld [vmem:[#allocation4 + $0x70] sm:$0xf]  ;;  %v3820_v51 = vld [vmem:[#allocation4 + $0x78] sm:$0xf0] }
 0x570   :  { %v2151_v54 = vpop.f32.mrf.mxu1 }
 0x573   :  { %v2123_v50 = vpop.f32.mrf.mxu3 }
 0x574   :  { %v2138_v52 = vadd.f32 %v2137_v49, %v2123_v50  ;;  %v4178_v49 = vld [vmem:[#allocation4 + $0x74] sm:$0xf]  ;;  %v3819_v50 = vor.u32 %v4179_v47, %v3818_v46  ;;  %v3860_v46 = vld [vmem:[#allocation4 + $0x148] sm:$0xf0]  ;;  %v3778_v47 = vld [vmem:[#allocation4 + $0x20] sm:$0xf] }
 0x575   :  { %v3823_v56 = vor.u32 %v4178_v49, %v3820_v51  ;;  %v4169_v49 = vld [vmem:[#allocation4 + $0x24] sm:$0xf0]  ;;  %v3863_v51 = vor.u32 %v4204_v11, %v3860_v46 }
 0x576   :  { %v2152_v58 = vadd.f32 %v2151_v54, %v2138_v52  ;;  %v3706_v52 = vld [vmem:[#allocation4 + $0x190] sm:$0xf]  ;;  %v4215_v54 = vld [vmem:[#allocation4 + $0x194] sm:$0xf0]  ;;  %2594 = vmatpush.bf16.msra.mxu3 %v3819_v50 }
 0x577   :  { %v3707_v57 = vor.u32 %v4215_v54, %v3706_v52  ;;  %v2160_v50 = vld [vmem:[#allocation6 + $0x150] sm:$0xff]  ;;  %v3779_v52 = vor.u32 %v4169_v49, %v3778_v47  ;;  %v4168_v54 = vld [vmem:[#allocation4 + $0x24] sm:$0xf] }
 0x578   :  { %2179 = vmatpush.msrb.mxu2 %v2152_v58  ;;  %v4214_v58 = vld [vmem:[#allocation4 + $0x194] sm:$0xf] }
 0x579   :  { %2481 = vmatpush.bf16.msrb.mxu0 %v3707_v57 }
 0x57a   :  { %2180 = vmatpush.msrb.mxu2 %v2150_v59  ;;  %v3708_v59 = vld [vmem:[#allocation4 + $0x198] sm:$0xf0] }
 0x57b   :  { %3631 = vmatmul.msk.f32.vlgmr.msrb.gmra.mxu2 %vm2161_vm11, %v2159_v60  ;;  %v3810_v60 = vld [vmem:[#allocation4 + $0x60] sm:$0xf] }
 0x57c   :  { %2336 = vmatpush.bf16.msra.mxu2 %v3695_v61  ;;  %v3711_v61 = vor.u32 %v4214_v58, %v3708_v59  ;;  %v3811_v63 = vor.u32 %v4177_v62, %v3810_v60  ;;  %v3850_v60 = vld [vmem:[#allocation4 + $0x130] sm:$0xf]  ;;  %v4202_v62 = vld [vmem:[#allocation4 + $0x134] sm:$0xf] }
 0x57e   :  { %2494 = vmatpush.bf16.msrb.mxu1 %v3711_v61  ;;  %2595 = vmatpush.bf16.msra.mxu3 %v3811_v63  ;;  %v4203_v61 = vld [vmem:[#allocation4 + $0x134] sm:$0xf0]  ;;  %v3770_v63 = vld [vmem:[#allocation4 + $0x10] sm:$0xf] }
 0x580   :  { %2337 = vmatpush.bf16.msra.mxu2 %v3687_v5  ;;  %v3812_v5 = vld [vmem:[#allocation4 + $0x68] sm:$0xf0] }
 0x581   :  { %v3815_v4 = vor.u32 %v4176_v6, %v3812_v5  ;;  %v3851_v6 = vor.u32 %v4203_v61, %v3850_v60  ;;  %v3852_v5 = vld [vmem:[#allocation4 + $0x138] sm:$0xf0] }
 0x582   :  { %2495 = vmatpush.bf16.msrb.mxu1 %v3703_v55  ;;  %2596 = vmatpush.bf16.msra.mxu3 %v3803_v28  ;;  %v4201_v55 = vld [vmem:[#allocation4 + $0x124] sm:$0xf0]  ;;  %v4164_v28 = vld [vmem:[#allocation4 + $0x4] sm:$0xf] }
 0x584   :  { %2338 = vmatpush.bf16.msra.mxu2 %v3679_v7  ;;  %v3698_v7 = vld [vmem:[#allocation4 + $0x180] sm:$0xf] }
 0x586   :  { %2597 = vmatpush.bf16.msra.mxu3 %v3795_v3 }
 0x588   :  { %2339 = vmatpush.bf16.msra.mxu2 %v3671_v37  ;;  %v3699_v37 = vor.u32 %v4213_v13, %v3698_v7  ;;  %v3855_v13 = vor.u32 %v4202_v62, %v3852_v5 }
 0x58a   :  { %2482 = vmatpush.bf16.msrb.mxu0 %v3699_v37  ;;  %2598 = vmatpush.bf16.msra.mxu3 %v3787_v0  ;;  %v4166_v37 = vld [vmem:[#allocation4 + $0x14] sm:$0xf]  ;;  %v3946_v0 = vld [vmem:[#allocation4 + $0x270] sm:$0xf] }
 0x58b   :  { %v3775_v14 = vor.u32 %v4166_v37, %v3772_v40 }
 0x58c   :  { %2340 = vmatpush.bf16.msra.mxu2 %v3663_v16  ;;  %v4210_v16 = vld [vmem:[#allocation4 + $0x174] sm:$0xf] }
 0x58d   :  { %v3887_v19 = vor.u32 %v4210_v16, %v3884_v17  ;;  %v3843_v17 = vor.u32 %v4201_v55, %v3842_v9 }
 0x58e   :  { %2714 = vmatpush.bf16.msra.mxu0 %v3883_v15  ;;  %2599 = vmatpush.bf16.msra.mxu3 %v3779_v52  ;;  %v4200_v15 = vld [vmem:[#allocation4 + $0x124] sm:$0xf] }
 0x58f   :  { %2727 = vmatpush.bf16.msra.mxu1 %v3887_v19  ;;  %v3762_v19 = vld [vmem:[#allocation4] sm:$0xf]  ;;  %v3847_v21 = vor.u32 %v4200_v15, %v3844_v18 }
 0x590   :  { %2341 = vmatpush.bf16.msra.mxu2 %v3655_v39  ;;  %v3875_v39 = vor.u32 %v4209_v30, %v3874_v2  ;;  %v3763_v22 = vor.u32 %v4165_v20, %v3762_v19  ;;  %v3834_v2 = vld [vmem:[#allocation4 + $0x110] sm:$0xf]  ;;  %v3938_v20 = vld [vmem:[#allocation4 + $0x260] sm:$0xf] }
 0x592   :  { %2715 = vmatpush.bf16.msra.mxu0 %v3875_v39  ;;  %v4199_v39 = vld [vmem:[#allocation4 + $0x114] sm:$0xf0] }
 0x593   :  { %2728 = vmatpush.bf16.msra.mxu1 %v3879_v38  ;;  %v3835_v27 = vor.u32 %v4199_v39, %v3834_v2  ;;  %v4240_v2 = vld [vmem:[#allocation4 + $0x264] sm:$0xf] }
 0x594   :  { %2342 = vmatpush.bf16.msra.mxu2 %v3647_v34  ;;  %v3867_v34 = vor.u32 %v4207_v32, %v3866_v31  ;;  %v4197_v31 = vld [vmem:[#allocation4 + $0x104] sm:$0xf0]  ;;  %v4196_v32 = vld [vmem:[#allocation4 + $0x104] sm:$0xf] }
 0x596   :  { %2716 = vmatpush.bf16.msra.mxu0 %v3867_v34  ;;  %v3828_v34 = vld [vmem:[#allocation4 + $0x108] sm:$0xf0] }
 0x597   :  { %2729 = vmatpush.bf16.msra.mxu1 %v3871_v53  ;;  %v3831_v35 = vor.u32 %v4196_v32, %v3828_v34  ;;  %v3932_v32 = vld [vmem:[#allocation4 + $0x258] sm:$0xf0] }
 0x598   :  { %2343 = vmatpush.bf16.msra.mxu2 %v3639_v48  ;;  %v3859_v48 = vor.u32 %v4205_v45, %v3858_v44  ;;  %v4010_v44 = vld [vmem:[#allocation4 + $0x2f0] sm:$0xf]  ;;  %v4259_v45 = vld [vmem:[#allocation4 + $0x2f4] sm:$0xf0] }
 0x599   :  { %v4011_v46 = vor.u32 %v4259_v45, %v4010_v44  ;;  %v4236_v44 = vld [vmem:[#allocation4 + $0x244] sm:$0xf]  ;;  %v3924_v45 = vld [vmem:[#allocation4 + $0x248] sm:$0xf0] }
 0x59a   :  { %2717 = vmatpush.bf16.msra.mxu0 %v3859_v48 }
 0x59b   :  { %2730 = vmatpush.bf16.msra.mxu1 %v3863_v51 }
 0x59c   :  { %2607 = vmatpush.bf16.msrb.mxu2 %v3823_v56  ;;  %v3780_v56 = vld [vmem:[#allocation4 + $0x28] sm:$0xf0] }
 0x59d   :  { %v3783_v57 = vor.u32 %v4168_v54, %v3780_v56  ;;  %v4242_v54 = vld [vmem:[#allocation4 + $0x274] sm:$0xf]  ;;  %v3948_v56 = vld [vmem:[#allocation4 + $0x278] sm:$0xf0] }
 0x59e   :  { %2718 = vmatpush.bf16.msra.mxu0 %v3851_v6  ;;  %v3951_v62 = vor.u32 %v4242_v54, %v3948_v56  ;;  %v4251_v56 = vld [vmem:[#allocation4 + $0x2b4] sm:$0xf0] }
 0x59f   :  { %2731 = vmatpush.bf16.msra.mxu1 %v3855_v13 }
 0x5a0   :  { %2608 = vmatpush.bf16.msrb.mxu2 %v3815_v4  ;;  %v4167_v4 = vld [vmem:[#allocation4 + $0x14] sm:$0xf0] }
 0x5a1   :  { %v3771_v1 = vor.u32 %v4167_v4, %v3770_v63 }
 0x5a2   :  { %2719 = vmatpush.bf16.msra.mxu0 %v3843_v17 }
 0x5a3   :  { %2600 = vmatpush.bf16.msra.mxu3 %v3771_v1  ;;  %2732 = vmatpush.bf16.msra.mxu1 %v3847_v21  ;;  %v4241_v21 = vld [vmem:[#allocation4 + $0x264] sm:$0xf0] }
 0x5a4   :  { %2609 = vmatpush.bf16.msrb.mxu2 %v3807_v24  ;;  %v3764_v24 = vld [vmem:[#allocation4 + $0x8] sm:$0xf0] }
 0x5a5   :  { %v3767_v12 = vor.u32 %v4164_v28, %v3764_v24  ;;  %v3939_v28 = vor.u32 %v4241_v21, %v3938_v20  ;;  %v4257_v24 = vld [vmem:[#allocation4 + $0x2e4] sm:$0xf0]  ;;  %v4247_v20 = vld [vmem:[#allocation4 + $0x294] sm:$0xf0] }
 0x5a6   :  { %2720 = vmatpush.bf16.msra.mxu0 %v3835_v27  ;;  %v4004_v27 = vld [vmem:[#allocation4 + $0x2e8] sm:$0xf0] }
 0x5a7   :  { %2601 = vmatpush.bf16.msra.mxu3 %v3763_v22  ;;  %2733 = vmatpush.bf16.msra.mxu1 %v3839_v25  ;;  %v4002_v22 = vld [vmem:[#allocation4 + $0x2e0] sm:$0xf]  ;;  %v4007_v10 = vor.u32 %v4256_v23, %v4004_v27  ;;  %v3994_v25 = vld [vmem:[#allocation4 + $0x2d0] sm:$0xf]  ;;  %v4229_v23 = vld [vmem:[#allocation4 + $0x204] sm:$0xf0] }
 0x5a8   :  { %2610 = vmatpush.bf16.msrb.mxu2 %v3799_v29  ;;  %v3826_v29 = vld [vmem:[#allocation4 + $0x100] sm:$0xf] }
 0x5a9   :  { %v3827_v33 = vor.u32 %v4197_v31, %v3826_v29  ;;  %v4255_v29 = vld [vmem:[#allocation4 + $0x2d4] sm:$0xf0]  ;;  %v4238_v31 = vld [vmem:[#allocation4 + $0x254] sm:$0xf]  ;;  %v3954_v27 = vld [vmem:[#allocation4 + $0x280] sm:$0xf] }
 0x5aa   :  { %v3935_v34 = vor.u32 %v4238_v31, %v3932_v32  ;;  %v4244_v31 = vld [vmem:[#allocation4 + $0x284] sm:$0xf]  ;;  %v3956_v32 = vld [vmem:[#allocation4 + $0x288] sm:$0xf0] }
 0x5ab   :  { %2721 = vmatpush.bf16.msra.mxu0 %v3827_v33  ;;  %2734 = vmatpush.bf16.msra.mxu1 %v3831_v35  ;;  %v3995_v33 = vor.u32 %v4255_v29, %v3994_v25  ;;  %v4254_v35 = vld [vmem:[#allocation4 + $0x2d4] sm:$0xf]  ;;  %v3892_v25 = vld [vmem:[#allocation4 + $0x208] sm:$0xf0] }
 0x5ac   :  { %2611 = vmatpush.bf16.msrb.mxu2 %v3791_v43  ;;  %v4243_v43 = vld [vmem:[#allocation4 + $0x274] sm:$0xf0] }
 0x5ad   :  { %v3947_v48 = vor.u32 %v4243_v43, %v3946_v0  ;;  %v4237_v0 = vld [vmem:[#allocation4 + $0x244] sm:$0xf0] }
 0x5ae   :  { %v4253_v43 = vld [vmem:[#allocation4 + $0x2c4] sm:$0xf0] }
 0x5b0   :  { %2612 = vmatpush.bf16.msrb.mxu2 %v3783_v57  ;;  %v4258_v57 = vld [vmem:[#allocation4 + $0x2f4] sm:$0xf] }
 0x5b4   :  { %2613 = vmatpush.bf16.msrb.mxu2 %v3775_v14 }
 0x5b8   :  { %2614 = vmatpush.bf16.msrb.mxu2 %v3767_v12  ;;  %v4003_v12 = vor.u32 %v4257_v24, %v4002_v22  ;;  %v4230_v22 = vld [vmem:[#allocation4 + $0x214] sm:$0xf] }
 0x5fe   :  { %v2182_v58 = vpop.f32.mrf.mxu2 }
 0x5ff   :  { %v2183_v59 = vadd.f32 %v2182_v58, %v2160_v50  ;;  %v4012_v58 = vld [vmem:[#allocation4 + $0x2f8] sm:$0xf0] }
 0x600   :  { %v4015_v6 = vor.u32 %v4258_v57, %v4012_v58  ;;  %v4234_v57 = vld [vmem:[#allocation4 + $0x234] sm:$0xf]  ;;  %v3916_v58 = vld [vmem:[#allocation4 + $0x238] sm:$0xf0] }
 0x601   :  { %v2185_v7 = vmax.f32 %v2183_v59, 0.0 }
 0x603   :  { %v2186_v16 = vpack.c.bf16 %v2185_v7, %v2185_v7 }
 0x605   :  { %v2188_v30 = vrot.slane %v2186_v16, 2 }
 0x607   :  { %v2191_v38 = vsel %vm4794_vm9, %v2186_v16, %v2188_v30  ;;  %v2193_v3 = vsel %vm2192_vm7, %v2186_v16, %v2188_v30  ;;  %v3940_v30 = vld [vmem:[#allocation4 + $0x268] sm:$0xf0] }
 0x608   :  { %v2195_v26 = vrot.slane %v2193_v3, 2  ;;  %2228 = vst [vmem:[#allocation1] ss:$4 sm:$0xff] %v2191_v38  ;;  %v3943_v39 = vor.u32 %v4240_v2, %v3940_v30  ;;  %v4239_v3 = vld [vmem:[#allocation4 + $0x254] sm:$0xf0] }
 0x609   :  { %v4246_v2 = vld [vmem:[#allocation4 + $0x294] sm:$0xf]  ;;  %v3964_v30 = vld [vmem:[#allocation4 + $0x298] sm:$0xf0] }
 0x60a   :  { %2233 = vst [vmem:[#allocation1 + $0x20] ss:$4 sm:$0xff] %v2195_v26 }
 0x60f   :  { %v2229_v36 = vld.sshfl [vmem:[#allocation1] sm:$0xff pattern:$0x73625140] }
 0x610   :  { %2381 = vst [vmem:[#allocation1] ss:$4 sm:$0xff] %v2191_v38  ;;  %v2236_v8 = vunpack.c.l.b16 %v2229_v36  ;;  %v3996_v36 = vld [vmem:[#allocation4 + $0x2d8] sm:$0xf0] }
 0x611   :  { %v2234_v53 = vld.sshfl [vmem:[#allocation1 + $0x20] sm:$0xff pattern:$0x73625140] }
 0x612   :  { %2385 = vst [vmem:[#allocation1 + $0x20] ss:$4 sm:$0xff] %v2195_v26  ;;  %v2237_v41 = vunpack.c.l.b16 %v2234_v53  ;;  %v2238_v42 = vrot.slane %v2236_v8, 1  ;;  %v3999_v8 = vor.u32 %v4254_v35, %v3996_v36  ;;  %v3922_v53 = vld [vmem:[#allocation4 + $0x240] sm:$0xf] }
 0x614   :  { %v2240_v11 = vsel %vm2239_vm0, %v2237_v41, %v2238_v42  ;;  %v3986_v41 = vld [vmem:[#allocation4 + $0x2c0] sm:$0xf]  ;;  %v3923_v42 = vor.u32 %v4237_v0, %v3922_v53 }
 0x615   :  { %v2241_v47 = vpack.c.b16 %v2240_v11, %v2240_v11  ;;  %v3987_v11 = vor.u32 %v4253_v43, %v3986_v41  ;;  %v2742_v43 = vld [vmem:[#allocation6] ss:$8 sm:$0x3] }
 0x617   :  { %v2382_v49 = vld.sshfl [vmem:[#allocation1] sm:$0xff pattern:$0x73625140]  ;;  %2331 = vmatmul.bf16.vlgmr.msrb.gmra.mxu3 %v2241_v47  ;;  %2344 = vmatmul.bf16.vlgmr.msra.gmra.mxu2 %v2241_v47  ;;  %v3988_v47 = vld [vmem:[#allocation4 + $0x2c8] sm:$0xf0] }
 0x618   :  { %2501 = vst [vmem:[#allocation1] ss:$4 sm:$0xff] %v2191_v38  ;;  %v2388_v50 = vunpack.c.l.b16 %v2382_v49  ;;  %2953 = vmatpush.bf16.msrb.mxu3 %v3947_v48  ;;  %2966 = vmatpush.bf16.msra.mxu2 %v4011_v46  ;;  %v3927_v48 = vor.u32 %v4236_v44, %v3924_v45  ;;  %v4252_v46 = vld [vmem:[#allocation4 + $0x2c4] sm:$0xf] }
 0x619   :  { %v2386_v51 = vld.sshfl [vmem:[#allocation1 + $0x20] sm:$0xff pattern:$0x73625140]  ;;  %v3991_v49 = vor.u32 %v4252_v46, %v3988_v47  ;;  %v2745_v47 = vperm.slane %v2742_v43, 1 }
 0x61a   :  { %2505 = vst [vmem:[#allocation1 + $0x20] ss:$4 sm:$0xff] %v2195_v26  ;;  %v2389_v52 = vunpack.c.l.b16 %v2386_v51  ;;  %v2390_v59 = vrot.slane %v2388_v50, 3  ;;  %v3914_v50 = vld [vmem:[#allocation4 + $0x230] sm:$0xf] }
 0x61b   :  { %v4235_v51 = vld [vmem:[#allocation4 + $0x234] sm:$0xf0] }
 0x61c   :  { %v2391_v60 = vrot.slane %v2389_v52, 2  ;;  %2954 = vmatpush.bf16.msrb.mxu3 %v3939_v28  ;;  %2967 = vmatpush.bf16.msra.mxu2 %v4003_v12  ;;  %v3978_v52 = vld [vmem:[#allocation4 + $0x2b0] sm:$0xf]  ;;  %v3915_v54 = vor.u32 %v4235_v51, %v3914_v50  ;;  %v3900_v28 = vld [vmem:[#allocation4 + $0x218] sm:$0xf0]  ;;  %v3967_v12 = vor.u32 %v4246_v2, %v3964_v30 }
 0x61d   :  { %v3903_v24 = vor.u32 %v4230_v22, %v3900_v28 }
 0x61e   :  { %v2392_v61 = vsel %vm2239_vm0, %v2391_v60, %v2390_v59  ;;  %v3979_v59 = vor.u32 %v4251_v56, %v3978_v52  ;;  %v3919_v60 = vor.u32 %v4234_v57, %v3916_v58 }
 0x61f   :  { %v2393_v5 = vpack.c.b16 %v2392_v61, %v2392_v61  ;;  %v2502_v63 = vld.sshfl [vmem:[#allocation1] sm:$0xff pattern:$0x73625140]  ;;  %v4250_v61 = vld [vmem:[#allocation4 + $0x2b4] sm:$0xf] }
 0x620   :  { %2620 = vst [vmem:[#allocation1] ss:$4 sm:$0xff] %v2191_v38  ;;  %v2508_v13 = vunpack.c.l.b16 %v2502_v63  ;;  %v3930_v38 = vld [vmem:[#allocation4 + $0x250] sm:$0xf]  ;;  %2968 = vmatpush.bf16.msra.mxu2 %v3995_v33  ;;  %v4233_v63 = vld [vmem:[#allocation4 + $0x224] sm:$0xf0]  ;;  %v3959_v33 = vor.u32 %v4244_v31, %v3956_v32 }
 0x621   :  { %2483 = vmatmul.bf16.vlgmr.msrb.gmra.mxu0 %v2393_v5  ;;  %2496 = vmatmul.bf16.vlgmr.msrb.gmra.mxu1 %v2393_v5  ;;  %v2506_v4 = vld.sshfl [vmem:[#allocation1 + $0x20] sm:$0xff pattern:$0x73625140]  ;;  %v3906_v5 = vld [vmem:[#allocation4 + $0x220] sm:$0xf] }
 0x622   :  { %v2509_v7 = vunpack.c.l.b16 %v2506_v4  ;;  %2624 = vst [vmem:[#allocation1 + $0x20] ss:$4 sm:$0xff] %v2195_v26  ;;  %2979 = vmatpush.bf16.msrb.mxu0 %v3951_v62  ;;  %2992 = vmatpush.bf16.msrb.mxu1 %v4015_v6  ;;  %v3931_v26 = vor.u32 %v4239_v3, %v3930_v38  ;;  %v3980_v62 = vld [vmem:[#allocation4 + $0x2b8] sm:$0xf0]  ;;  %v3970_v4 = vld [vmem:[#allocation4 + $0x2a0] sm:$0xf] }
 0x623   :  { %v3983_v6 = vor.u32 %v4250_v61, %v3980_v62  ;;  %v4245_v38 = vld [vmem:[#allocation4 + $0x284] sm:$0xf0]  ;;  %v4228_v3 = vld [vmem:[#allocation4 + $0x204] sm:$0xf] }
 0x624   :  { %v2510_v1 = vrot.slane %v2509_v7, 7  ;;  %2955 = vmatpush.bf16.msrb.mxu3 %v3931_v26  ;;  %2969 = vmatpush.bf16.msra.mxu2 %v3987_v11  ;;  %v3907_v7 = vor.u32 %v4233_v63, %v3906_v5  ;;  %v3955_v26 = vor.u32 %v4245_v38, %v3954_v27  ;;  %v3895_v29 = vor.u32 %v4228_v3, %v3892_v25  ;;  %v3021_v38 = vld [vmem:[#allocation6 + $0x3] ss:$0 sm:$0xff] }
 0x626   :  { %v2511_v37 = vsel %vm2239_vm0, %v2510_v1, %v2508_v13  ;;  %2980 = vmatpush.bf16.msrb.mxu0 %v3943_v39  ;;  %2993 = vmatpush.bf16.msrb.mxu1 %v4007_v10  ;;  %v4249_v13 = vld [vmem:[#allocation4 + $0x2a4] sm:$0xf0]  ;;  %v4232_v1 = vld [vmem:[#allocation4 + $0x224] sm:$0xf]  ;;  %v3890_v39 = vld [vmem:[#allocation4 + $0x200] sm:$0xf] }
 0x627   :  { %v2512_v40 = vpack.c.b16 %v2511_v37, %v2511_v37  ;;  %v2621_v14 = vld.sshfl [vmem:[#allocation1] sm:$0xff pattern:$0x73625140]  ;;  %v3908_v37 = vld [vmem:[#allocation4 + $0x228] sm:$0xf0]  ;;  %v3891_v10 = vor.u32 %v4229_v23, %v3890_v39 }
 0x628   :  { %v2627_v9 = vunpack.c.l.b16 %v2621_v14  ;;  %2956 = vmatpush.bf16.msrb.mxu3 %v3923_v42  ;;  %2970 = vmatpush.bf16.msra.mxu2 %v3979_v59  ;;  %v3911_v14 = vor.u32 %v4232_v1, %v3908_v37 }
 0x629   :  { %2602 = vmatmul.bf16.vlgmr.msra.gmra.mxu3 %v2512_v40  ;;  %2615 = vmatmul.bf16.vlgmr.msrb.gmra.mxu2 %v2512_v40  ;;  %v2625_v55 = vld.sshfl [vmem:[#allocation1 + $0x20] sm:$0xff pattern:$0x73625140]  ;;  %v3971_v40 = vor.u32 %v4249_v13, %v3970_v4 }
 0x62a   :  { %v2628_v15 = vunpack.c.l.b16 %v2625_v55  ;;  %v2629_v16 = vrot.slane %v2627_v9, 2  ;;  %2981 = vmatpush.bf16.msrb.mxu0 %v3935_v34  ;;  %2994 = vmatpush.bf16.msrb.mxu1 %v3999_v8  ;;  %v4248_v9 = vld [vmem:[#allocation4 + $0x2a4] sm:$0xf]  ;;  %v3972_v55 = vld [vmem:[#allocation4 + $0x2a8] sm:$0xf0] }
 0x62c   :  { %v2630_v17 = vrot.slane %v2628_v15, 1  ;;  %2957 = vmatpush.bf16.msrb.mxu3 %v3915_v54  ;;  %v3975_v15 = vor.u32 %v4248_v9, %v3972_v55  ;;  %2971 = vmatpush.bf16.msra.mxu2 %v3971_v40  ;;  %v3008_v55 = vld [vmem:[#allocation6 + $0x2] ss:$8 sm:$0x3] }
 0x62d   :  { %v3010_v28 = vperm.slane %v3008_v55, 0 }
 0x62e   :  { %v2631_v18 = vsel %vm2239_vm0, %v2630_v17, %v2629_v16  ;;  %2982 = vmatpush.bf16.msrb.mxu0 %v3927_v48  ;;  %2995 = vmatpush.bf16.msrb.mxu1 %v3991_v49  ;;  %v3898_v16 = vld [vmem:[#allocation4 + $0x210] sm:$0xf]  ;;  %v4231_v17 = vld [vmem:[#allocation4 + $0x214] sm:$0xf0]  ;;  %v2744_v48 = vperm.slane %v2742_v43, 0 }
 0x62f   :  { %v2632_v19 = vpack.c.b16 %v2631_v18, %v2631_v18  ;;  %v3962_v18 = vld [vmem:[#allocation4 + $0x290] sm:$0xf] }
 0x630   :  { %2958 = vmatpush.bf16.msrb.mxu3 %v3907_v7  ;;  %v3963_v21 = vor.u32 %v4247_v20, %v3962_v18  ;;  %v2787_v7 = vld [vmem:[#allocation6 + $0x1] ss:$8 sm:$0x3] }
 0x631   :  { %2722 = vmatmul.bf16.vlgmr.msra.gmra.mxu0 %v2632_v19  ;;  %2735 = vmatmul.bf16.vlgmr.msra.gmra.mxu1 %v2632_v19  ;;  %v3899_v19 = vor.u32 %v4231_v17, %v3898_v16  ;;  %v2790_v13 = vperm.slane %v2787_v7, 1 }
 0x632   :  { %2983 = vmatpush.bf16.msrb.mxu0 %v3919_v60  ;;  %2996 = vmatpush.bf16.msrb.mxu1 %v3983_v6 }
 0x633   :  { %2972 = vmatpush.bf16.msra.mxu2 %v3963_v21 }
 0x634   :  { %2959 = vmatpush.bf16.msrb.mxu3 %v3899_v19  ;;  %v3011_v19 = vperm.slane %v3008_v55, 1 }
 0x636   :  { %2984 = vmatpush.bf16.msrb.mxu0 %v3911_v14  ;;  %2997 = vmatpush.bf16.msrb.mxu1 %v3975_v15  ;;  %v2789_v14 = vperm.slane %v2787_v7, 0 }
 0x637   :  { %2973 = vmatpush.bf16.msra.mxu2 %v3955_v26 }
 0x638   :  { %2960 = vmatpush.bf16.msrb.mxu3 %v3891_v10 }
 0x63a   :  { %2985 = vmatpush.bf16.msrb.mxu0 %v3903_v24  ;;  %2998 = vmatpush.bf16.msrb.mxu1 %v3967_v12 }
 0x63e   :  { %2986 = vmatpush.bf16.msrb.mxu0 %v3895_v29  ;;  %2999 = vmatpush.bf16.msrb.mxu1 %v3959_v33 }
 0x69a   :  { %v2332_v34 = vpop.f32.mrf.mxu3  ;;  %v2345_v35 = vpop.f32.mrf.mxu2 }
 0x69e   :  { %v2484_v36 = vpop.f32.mrf.mxu0  ;;  %v2497_v8 = vpop.f32.mrf.mxu1 }
 0x6a2   :  { %v2334_v53 = vpop.f32.mrf.mxu3  ;;  %v2347_v0 = vpop.f32.mrf.mxu2 }
 0x6a6   :  { %v2486_v41 = vpop.f32.mrf.mxu0  ;;  %v2499_v42 = vpop.f32.mrf.mxu1 }
 0x6ac   :  { %v2603_v44 = vpop.f32.mrf.mxu3  ;;  %v2616_v45 = vpop.f32.mrf.mxu2 }
 0x6ad   :  { %v2604_v49 = vadd.f32 %v2603_v44, %v2332_v34  ;;  %v2617_v50 = vadd.f32 %v2616_v45, %v2345_v35 }
 0x6ae   :  { %v2723_v11 = vpop.f32.mrf.mxu0  ;;  %v2736_v46 = vpop.f32.mrf.mxu1 }
 0x6af   :  { %v2724_v51 = vadd.f32 %v2723_v11, %v2484_v36  ;;  %v2737_v52 = vadd.f32 %v2736_v46, %v2497_v8 }
 0x6b1   :  { %v2740_v54 = vadd.f32 %v2724_v51, %v2604_v49  ;;  %v2741_v56 = vadd.f32 %v2737_v52, %v2617_v50 }
 0x6b3   :  { %v2748_v57 = vadd.f32 %v2744_v48, %v2740_v54  ;;  %v2749_v58 = vadd.f32 %v2745_v47, %v2741_v56 }
 0x6b4   :  { %v2605_v59 = vpop.f32.mrf.mxu3  ;;  %v2618_v60 = vpop.f32.mrf.mxu2 }
 0x6b5   :  { %v2750_v61 = vmax.f32 %v2748_v57, 0.0  ;;  %v2751_v62 = vmax.f32 %v2749_v58, 0.0 }
 0x6b6   :  { %v2725_v6 = vpop.f32.mrf.mxu0  ;;  %v2738_v5 = vpop.f32.mrf.mxu1 }
 0x6b7   :  { %v2752_v63 = vpack.c.bf16 %v2750_v61, %v2750_v61  ;;  %v2753_v4 = vpack.c.bf16 %v2751_v62, %v2751_v62 }
 0x6b9   :  { %2961 = vmatmul.bf16.vlgmr.msrb.gmra.mxu3 %v2752_v63  ;;  %2974 = vmatmul.bf16.vlgmr.msra.gmra.mxu2 %v2753_v4 }
 0x6ba   :  { %2987 = vmatmul.bf16.vlgmr.msrb.gmra.mxu0 %v2752_v63  ;;  %3000 = vmatmul.bf16.vlgmr.msrb.gmra.mxu1 %v2753_v4 }
 0x737   :  { %v2988_v1 = vpop.f32.mrf.mxu0  ;;  %v3001_v37 = vpop.f32.mrf.mxu1 }
 0x738   :  { %v2989_v40 = vadd.f32 %v2988_v1, %v2790_v13 }
 0x73a   :  { %v3002_v9 = vadd.f32 %v3001_v37, %v2989_v40 }
 0x73c   :  { %v2962_v15 = vpop.f32.mrf.mxu3  ;;  %v2975_v16 = vpop.f32.mrf.mxu2  ;;  %v3006_v17 = vmax.f32 %v3002_v9, 0.0 }
 0x73d   :  { %v2963_v18 = vadd.f32 %v2962_v15, %v2789_v14 }
 0x73e   :  { %v3015_v2 = vmul.f32 %v3011_v19, %v3006_v17 }
 0x73f   :  { %v2976_v20 = vadd.f32 %v2975_v16, %v2963_v18  ;;  %v2990_v21 = vpop.f32.mrf.mxu0  ;;  %v3003_v22 = vpop.f32.mrf.mxu1 }
 0x740   :  { %v3017_v27 = vsel %vm4796_vm15, %v3015_v2, 0.0 }
 0x741   :  { %v3005_v24 = vmax.f32 %v2976_v20, 0.0 }
 0x743   :  { %v3014_v30 = vmul.f32 %v3010_v28, %v3005_v24 }
 0x744   :  { %v2964_v12 = vpop.f32.mrf.mxu3  ;;  %v2977_v39 = vpop.f32.mrf.mxu2 }
 0x745   :  { %v3016_v23 = vsel %vm4795_vm12, %v3014_v30, 0.0 }
 0x746   :  { %v3018_v10 = vadd.f32 %v3017_v27, %v3016_v23 }
 0x748   :  { %3019 = vadd.xlane.f32.xlu0 %v3018_v10 }
 0x7bb   :  { %v3020_v3 = vpop.xlane.xlu0 %3019 }
 0x7bc   :  { %v3022_v25 = vadd.f32 %v3021_v38, %v3020_v3 }
 0x7be   :  { %3024 = vst.msk [vmem:[%s4743_s4] sm:$0x3] %vm3023_vm2, %v3022_v25 }
 0x7bf   :  { %3029 = vsyncpa [#allocation3], 1 }
 0x7c0   :  { %3030 = vsyncpa [#allocation5], 1 }

</bundles_post_ra>
